<compile_context>
chip_gen: v7x
topology: tpu7x:2x2x1
jax: 0.10.0
libtpu: 0.0.40
codegen_flags: <defaults>
</compile_context>

<pallas_src>
import jax
import jax.numpy as jnp
from jax.experimental import pallas as pl
from jax.experimental.pallas import tpu as pltpu


INPUT_SIZE = 28 * 28    # 784
HIDDEN_SIZE = 500
OUTPUT_SIZE = 10

# Lane-padded (multiple-of-128) sizes used inside the kernel.
IN_PAD = 896            # 784 -> 7*128
HID_PAD = 512           # 500 -> 4*128
OUT_PAD = 128           # 10  -> 1*128


def _round_up(n, m):
    return ((n + m - 1) // m) * m


def _pad2d(a, rows, cols):
    r, c = a.shape
    return jnp.pad(a, ((0, rows - r), (0, cols - c)))


def _mlp_kernel(x_ref,
                w1_ref, b1_ref,
                w2_ref, b2_ref,
                w3_ref, b3_ref,
                w4_ref, b4_ref,
                o_ref,
                h_ref):
    # fc1: bf16 x bf16 -> f32 accumulate on MXU, bias add on VPU in f32.
    h = jnp.dot(x_ref[...], w1_ref[...],
                preferred_element_type=jnp.float32) + b1_ref[...]
    h_ref[...] = h.astype(jnp.bfloat16)

    # fc2
    h = jnp.dot(h_ref[...], w2_ref[...],
                preferred_element_type=jnp.float32) + b2_ref[...]
    h_ref[...] = h.astype(jnp.bfloat16)

    # fc3
    h = jnp.dot(h_ref[...], w3_ref[...],
                preferred_element_type=jnp.float32) + b3_ref[...]
    h_ref[...] = h.astype(jnp.bfloat16)

    # fc4 (output kept in f32, lane-dense padded N=128)
    o_ref[...] = (jnp.dot(h_ref[...], w4_ref[...],
                          preferred_element_type=jnp.float32)
                  + b4_ref[...]).astype(o_ref.dtype)


def mlp_forward(x_nchw, params, tb=256):
    """x_nchw: (B, 1, H, W) with H*W == 784. Returns (B, OUTPUT_SIZE) f32."""
    b, c, h, w = x_nchw.shape
    # Matches the PyTorch reshape(batch, height*width) — requires channel == 1.
    x2d = x_nchw.reshape(b, h * w).astype(jnp.float32)

    # Batch tile: fill the MXU M dimension when batch allows; keep sublane-aligned.
    tb = min(tb, _round_up(b, 8))
    b_pad = _round_up(b, tb)

    x_p = _pad2d(x2d, b_pad, IN_PAD).astype(jnp.bfloat16)

    (w1, b1), (w2, b2), (w3, b3), (w4, b4) = params
    w1p = _pad2d(w1, IN_PAD, HID_PAD).astype(jnp.bfloat16)
    w2p = _pad2d(w2, HID_PAD, HID_PAD).astype(jnp.bfloat16)
    w3p = _pad2d(w3, HID_PAD, HID_PAD).astype(jnp.bfloat16)
    w4p = _pad2d(w4, HID_PAD, OUT_PAD).astype(jnp.bfloat16)
    b1p = _pad2d(b1, 1, HID_PAD)
    b2p = _pad2d(b2, 1, HID_PAD)
    b3p = _pad2d(b3, 1, HID_PAD)
    b4p = _pad2d(b4, 1, OUT_PAD)

    # Weights/biases: constant block index across the batch grid -> stay VMEM
    # resident, DMA'd only once per pallas_call.
    resident = lambda shape: pl.BlockSpec(shape, lambda i: (0, 0))

    out_p = pl.pallas_call(
        _mlp_kernel,
        out_shape=jax.ShapeDtypeStruct((b_pad, OUT_PAD), jnp.float32),
        grid=(b_pad // tb,),
        in_specs=[
            pl.BlockSpec((tb, IN_PAD), lambda i: (i, 0)),
            resident(w1p.shape), resident(b1p.shape),
            resident(w2p.shape), resident(b2p.shape),
            resident(w3p.shape), resident(b3p.shape),
            resident(w4p.shape), resident(b4p.shape),
        ],
        out_specs=pl.BlockSpec((tb, OUT_PAD), lambda i: (i, 0)),
        scratch_shapes=[pltpu.VMEM((tb, HID_PAD), jnp.bfloat16)],
        compiler_params=pltpu.CompilerParams(
            dimension_semantics=("parallel",),
            vmem_limit_bytes=24 << 20,   # real footprint < 4 MiB; stays safe on v7x
        ),
    )(x_p, w1p, b1p, w2p, b2p, w3p, b3p, w4p, b4p)

    # Strip batch padding and the 10->128 output padding.
    return out_p[:b, :OUTPUT_SIZE]


def init_params(key):
    """Weights stored as (in, out) (transposed vs. PyTorch's (out, in));
    biases as (1, out) for 2-D broadcasting inside the kernel."""
    dims = [(INPUT_SIZE, HIDDEN_SIZE),
            (HIDDEN_SIZE, HIDDEN_SIZE),
            (HIDDEN_SIZE, HIDDEN_SIZE),
            (HIDDEN_SIZE, OUTPUT_SIZE)]
    params = []
    for (fan_in, fan_out) in dims:
        key, kw, kb = jax.random.split(key, 3)
        bound = 1.0 / (fan_in ** 0.5)          # PyTorch nn.Linear default range
        wgt = jax.random.uniform(kw, (fan_in, fan_out), jnp.float32, -bound, bound)
        bias = jax.random.uniform(kb, (1, fan_out), jnp.float32, -bound, bound)
        params.append((wgt, bias))
    return params


def _reference_forward_f32(x_nchw, params):
    b, c, h, w = x_nchw.shape
    a = x_nchw.reshape(b, h * w).astype(jnp.float32)
    for (wgt, bias) in params:
        a = a @ wgt + bias
    return a


def _reference_forward_mixed(x_nchw, params):
    """Plain-JAX reference using the same bf16-input / f32-accumulate recipe."""
    b, c, h, w = x_nchw.shape
    a = x_nchw.reshape(b, h * w).astype(jnp.bfloat16)
    n = len(params)
    for li, (wgt, bias) in enumerate(params):
        a = jnp.dot(a, wgt.astype(jnp.bfloat16),
                    preferred_element_type=jnp.float32) + bias
        if li < n - 1:
            a = a.astype(jnp.bfloat16)
    return a


if __name__ == "__main__":
    key = jax.random.PRNGKey(0)
    kx, kp = jax.random.split(key)
    params = init_params(kp)

    # Two cases: tiny batch (single grid step) and a case that exercises the
    # batch grid + padding (100 rows, tile 32 -> grid of 4).
    for batch, tb in [(8, 256), (100, 32)]:
        kx, kcase = jax.random.split(kx)
        x = jax.random.normal(kcase, (batch, 1, 28, 28), dtype=jnp.float32)

        y = mlp_forward(x, params, tb=tb)
        y = jax.block_until_ready(y)
        assert y.shape == (batch, OUTPUT_SIZE)

        # Tight check against a reference using the same mixed precision.
        y_mix = _reference_forward_mixed(x, params)
        assert jnp.allclose(y, y_mix, atol=1e-2, rtol=1e-2)

        # Looser check against the pure-f32 reference (bf16 rounding error only).
        y_f32 = _reference_forward_f32(x, params)
        assert jnp.allclose(y, y_f32, atol=6e-2, rtol=6e-2)

    print("KERNEL_OK")
</pallas_src>

<mosaic_0001>
module attributes {stable_mosaic.version = 11 : i64} {
  func.func @_mlp_kernel(%arg0: i32, %arg1: memref<8x896xbf16, #tpu.memory_space<vmem>>, %arg2: memref<896x512xbf16, #tpu.memory_space<vmem>>, %arg3: memref<1x512xf32, #tpu.memory_space<vmem>>, %arg4: memref<512x512xbf16, #tpu.memory_space<vmem>>, %arg5: memref<1x512xf32, #tpu.memory_space<vmem>>, %arg6: memref<512x512xbf16, #tpu.memory_space<vmem>>, %arg7: memref<1x512xf32, #tpu.memory_space<vmem>>, %arg8: memref<512x128xbf16, #tpu.memory_space<vmem>>, %arg9: memref<1x128xf32, #tpu.memory_space<vmem>>, %arg10: memref<8x128xf32, #tpu.memory_space<vmem>>, %arg11: memref<8x512xbf16, #tpu.memory_space<vmem>>) attributes {dimension_semantics = [#tpu.dimension_semantics<parallel>], iteration_bounds = array<i64: 1>, scalar_prefetch = 0 : i64, scratch_operands = 1 : i64, tpu.core_type = #tpu.core_type<tc>, window_params = [{transform_indices = @transform_0, window_bounds = array<i64: 8, 896>}, {pipeline_mode = #tpu.pipeline_mode<synchronous>, transform_indices = @transform_1, window_bounds = array<i64: 896, 512>}, {pipeline_mode = #tpu.pipeline_mode<synchronous>, transform_indices = @transform_2, window_bounds = array<i64: 1, 512>}, {pipeline_mode = #tpu.pipeline_mode<synchronous>, transform_indices = @transform_3, window_bounds = array<i64: 512, 512>}, {pipeline_mode = #tpu.pipeline_mode<synchronous>, transform_indices = @transform_4, window_bounds = array<i64: 1, 512>}, {pipeline_mode = #tpu.pipeline_mode<synchronous>, transform_indices = @transform_5, window_bounds = array<i64: 512, 512>}, {pipeline_mode = #tpu.pipeline_mode<synchronous>, transform_indices = @transform_6, window_bounds = array<i64: 1, 512>}, {pipeline_mode = #tpu.pipeline_mode<synchronous>, transform_indices = @transform_7, window_bounds = array<i64: 512, 128>}, {pipeline_mode = #tpu.pipeline_mode<synchronous>, transform_indices = @transform_8, window_bounds = array<i64: 1, 128>}, {transform_indices = @transform_9, window_bounds = array<i64: 8, 128>}]} {
    %c0 = arith.constant 0 : index
    %c0_0 = arith.constant 0 : index
    %0 = vector.load %arg1[%c0, %c0_0] : memref<8x896xbf16, #tpu.memory_space<vmem>>, vector<8x896xbf16>
    %c0_1 = arith.constant 0 : index
    %c0_2 = arith.constant 0 : index
    %1 = vector.load %arg2[%c0_1, %c0_2] : memref<896x512xbf16, #tpu.memory_space<vmem>>, vector<896x512xbf16>
    %cst = arith.constant dense<0.000000e+00> : vector<8x512xf32>
    %2 = tpu.matmul %0, %1, %cst {dimension_numbers = #tpu.dot_dimension_numbers<[1], [0], [0], [1], [0, 0, 1, 1], [], []>} : vector<8x896xbf16>, vector<896x512xbf16>, vector<8x512xf32> -> vector<8x512xf32>
    %c0_3 = arith.constant 0 : index
    %c0_4 = arith.constant 0 : index
    %3 = vector.load %arg3[%c0_3, %c0_4] : memref<1x512xf32, #tpu.memory_space<vmem>>, vector<1x512xf32>
    %4 = vector.broadcast %3 : vector<1x512xf32> to vector<8x512xf32>
    %5 = arith.addf %2, %4 : vector<8x512xf32>
    %6 = arith.truncf %5 : vector<8x512xf32> to vector<8x512xbf16>
    %c0_5 = arith.constant 0 : index
    %c0_6 = arith.constant 0 : index
    %7 = vector.load %arg11[%c0_5, %c0_6] : memref<8x512xbf16, #tpu.memory_space<vmem>>, vector<8x512xbf16>
    tpu.vector_store %arg11[%c0_5, %c0_6], %6 {strides = array<i32>} : memref<8x512xbf16, #tpu.memory_space<vmem>>, vector<8x512xbf16>,
    %c0_7 = arith.constant 0 : index
    %c0_8 = arith.constant 0 : index
    %8 = vector.load %arg11[%c0_7, %c0_8] : memref<8x512xbf16, #tpu.memory_space<vmem>>, vector<8x512xbf16>
    %c0_9 = arith.constant 0 : index
    %c0_10 = arith.constant 0 : index
    %9 = vector.load %arg4[%c0_9, %c0_10] : memref<512x512xbf16, #tpu.memory_space<vmem>>, vector<512x512xbf16>
    %cst_11 = arith.constant dense<0.000000e+00> : vector<8x512xf32>
    %10 = tpu.matmul %8, %9, %cst_11 {dimension_numbers = #tpu.dot_dimension_numbers<[1], [0], [0], [1], [0, 0, 1, 1], [], []>} : vector<8x512xbf16>, vector<512x512xbf16>, vector<8x512xf32> -> vector<8x512xf32>
    %c0_12 = arith.constant 0 : index
    %c0_13 = arith.constant 0 : index
    %11 = vector.load %arg5[%c0_12, %c0_13] : memref<1x512xf32, #tpu.memory_space<vmem>>, vector<1x512xf32>
    %12 = vector.broadcast %11 : vector<1x512xf32> to vector<8x512xf32>
    %13 = arith.addf %10, %12 : vector<8x512xf32>
    %14 = arith.truncf %13 : vector<8x512xf32> to vector<8x512xbf16>
    %c0_14 = arith.constant 0 : index
    %c0_15 = arith.constant 0 : index
    %15 = vector.load %arg11[%c0_14, %c0_15] : memref<8x512xbf16, #tpu.memory_space<vmem>>, vector<8x512xbf16>
    tpu.vector_store %arg11[%c0_14, %c0_15], %14 {strides = array<i32>} : memref<8x512xbf16, #tpu.memory_space<vmem>>, vector<8x512xbf16>,
    %c0_16 = arith.constant 0 : index
    %c0_17 = arith.constant 0 : index
    %16 = vector.load %arg11[%c0_16, %c0_17] : memref<8x512xbf16, #tpu.memory_space<vmem>>, vector<8x512xbf16>
    %c0_18 = arith.constant 0 : index
    %c0_19 = arith.constant 0 : index
    %17 = vector.load %arg6[%c0_18, %c0_19] : memref<512x512xbf16, #tpu.memory_space<vmem>>, vector<512x512xbf16>
    %cst_20 = arith.constant dense<0.000000e+00> : vector<8x512xf32>
    %18 = tpu.matmul %16, %17, %cst_20 {dimension_numbers = #tpu.dot_dimension_numbers<[1], [0], [0], [1], [0, 0, 1, 1], [], []>} : vector<8x512xbf16>, vector<512x512xbf16>, vector<8x512xf32> -> vector<8x512xf32>
    %c0_21 = arith.constant 0 : index
    %c0_22 = arith.constant 0 : index
    %19 = vector.load %arg7[%c0_21, %c0_22] : memref<1x512xf32, #tpu.memory_space<vmem>>, vector<1x512xf32>
    %20 = vector.broadcast %19 : vector<1x512xf32> to vector<8x512xf32>
    %21 = arith.addf %18, %20 : vector<8x512xf32>
    %22 = arith.truncf %21 : vector<8x512xf32> to vector<8x512xbf16>
    %c0_23 = arith.constant 0 : index
    %c0_24 = arith.constant 0 : index
    %23 = vector.load %arg11[%c0_23, %c0_24] : memref<8x512xbf16, #tpu.memory_space<vmem>>, vector<8x512xbf16>
    tpu.vector_store %arg11[%c0_23, %c0_24], %22 {strides = array<i32>} : memref<8x512xbf16, #tpu.memory_space<vmem>>, vector<8x512xbf16>,
    %c0_25 = arith.constant 0 : index
    %c0_26 = arith.constant 0 : index
    %24 = vector.load %arg11[%c0_25, %c0_26] : memref<8x512xbf16, #tpu.memory_space<vmem>>, vector<8x512xbf16>
    %c0_27 = arith.constant 0 : index
    %c0_28 = arith.constant 0 : index
    %25 = vector.load %arg8[%c0_27, %c0_28] : memref<512x128xbf16, #tpu.memory_space<vmem>>, vector<512x128xbf16>
    %cst_29 = arith.constant dense<0.000000e+00> : vector<8x128xf32>
    %26 = tpu.matmul %24, %25, %cst_29 {dimension_numbers = #tpu.dot_dimension_numbers<[1], [0], [0], [1], [0, 0, 1, 1], [], []>} : vector<8x512xbf16>, vector<512x128xbf16>, vector<8x128xf32> -> vector<8x128xf32>
    %c0_30 = arith.constant 0 : index
    %c0_31 = arith.constant 0 : index
    %27 = vector.load %arg9[%c0_30, %c0_31] : memref<1x128xf32, #tpu.memory_space<vmem>>, vector<1x128xf32>
    %28 = vector.broadcast %27 : vector<1x128xf32> to vector<8x128xf32>
    %29 = arith.addf %26, %28 : vector<8x128xf32>
    %c0_32 = arith.constant 0 : index
    %c0_33 = arith.constant 0 : index
    %30 = vector.load %arg10[%c0_32, %c0_33] : memref<8x128xf32, #tpu.memory_space<vmem>>, vector<8x128xf32>
    tpu.vector_store %arg10[%c0_32, %c0_33], %29 {strides = array<i32>} : memref<8x128xf32, #tpu.memory_space<vmem>>, vector<8x128xf32>,
    return
  }
  func.func @transform_0(%arg0: i32) -> (i32, i32) {
    %c0_i32 = arith.constant 0 : i32
    %c0_i32_0 = arith.constant 0 : i32
    return %arg0, %c0_i32 : i32, i32
  }
  func.func @transform_1(%arg0: i32) -> (i32, i32) {
    %c0_i32 = arith.constant 0 : i32
    %c0_i32_0 = arith.constant 0 : i32
    %c0_i32_1 = arith.constant 0 : i32
    return %c0_i32, %c0_i32_0 : i32, i32
  }
  func.func @transform_2(%arg0: i32) -> (i32, i32) {
    %c0_i32 = arith.constant 0 : i32
    %c0_i32_0 = arith.constant 0 : i32
    %c0_i32_1 = arith.constant 0 : i32
    return %c0_i32, %c0_i32_0 : i32, i32
  }
  func.func @transform_3(%arg0: i32) -> (i32, i32) {
    %c0_i32 = arith.constant 0 : i32
    %c0_i32_0 = arith.constant 0 : i32
    %c0_i32_1 = arith.constant 0 : i32
    return %c0_i32, %c0_i32_0 : i32, i32
  }
  func.func @transform_4(%arg0: i32) -> (i32, i32) {
    %c0_i32 = arith.constant 0 : i32
    %c0_i32_0 = arith.constant 0 : i32
    %c0_i32_1 = arith.constant 0 : i32
    return %c0_i32, %c0_i32_0 : i32, i32
  }
  func.func @transform_5(%arg0: i32) -> (i32, i32) {
    %c0_i32 = arith.constant 0 : i32
    %c0_i32_0 = arith.constant 0 : i32
    %c0_i32_1 = arith.constant 0 : i32
    return %c0_i32, %c0_i32_0 : i32, i32
  }
  func.func @transform_6(%arg0: i32) -> (i32, i32) {
    %c0_i32 = arith.constant 0 : i32
    %c0_i32_0 = arith.constant 0 : i32
    %c0_i32_1 = arith.constant 0 : i32
    return %c0_i32, %c0_i32_0 : i32, i32
  }
  func.func @transform_7(%arg0: i32) -> (i32, i32) {
    %c0_i32 = arith.constant 0 : i32
    %c0_i32_0 = arith.constant 0 : i32
    %c0_i32_1 = arith.constant 0 : i32
    return %c0_i32, %c0_i32_0 : i32, i32
  }
  func.func @transform_8(%arg0: i32) -> (i32, i32) {
    %c0_i32 = arith.constant 0 : i32
    %c0_i32_0 = arith.constant 0 : i32
    %c0_i32_1 = arith.constant 0 : i32
    return %c0_i32, %c0_i32_0 : i32, i32
  }
  func.func @transform_9(%arg0: i32) -> (i32, i32) {
    %c0_i32 = arith.constant 0 : i32
    %c0_i32_0 = arith.constant 0 : i32
    return %arg0, %c0_i32 : i32, i32
  }
}

</mosaic_0001>

<bundles_post_ra>
// kernel: tpu_custom_call.1
= control target key start
LH: loop header
LB: loop body
LE: loop exit
PB: predicated region body
PF: predicated region fallthrough
CT: control target
= control target key end

     0   :  { %14 = vsyncpa [#allocation4], 0  ;;  %s5966_s0 = inlined_call_operand.hbm [shape: bf16[8,896], index: 0, kind: input, shape index: {}]   ;;  %s5967_s1 = inlined_call_operand.hbm [shape: bf16[896,512], index: 1, kind: input, shape index: {}]   ;;  %s5968_s2 = inlined_call_operand.vmem [shape: f32[1,512], index: 2, kind: input, shape index: {}]   ;;  %s5969_s3 = inlined_call_operand.hbm [shape: bf16[512,512], index: 3, kind: input, shape index: {}]   ;;  %s5970_s4 = inlined_call_operand.vmem [shape: f32[1,512], index: 4, kind: input, shape index: {}]   ;;  %s5971_s5 = inlined_call_operand.hbm [shape: bf16[512,512], index: 5, kind: input, shape index: {}]   ;;  %s5972_s6 = inlined_call_operand.vmem [shape: f32[1,512], index: 6, kind: input, shape index: {}]   ;;  %s5973_s7 = inlined_call_operand.hbm [shape: bf16[512,128], index: 7, kind: input, shape index: {}]   ;;  %s5974_s8 = inlined_call_operand.vmem [shape: f32[1,128], index: 8, kind: input, shape index: {}]   ;;  %s5975_s9 = inlined_call_operand.hbm [shape: f32[8,128], index: 9, kind: output, shape index: {}]  }
   0x1   :  { %15 = vsyncpa [#allocation7], 0 }
   0x2   :  { %16 = vsyncpa [#allocation10], 0 }
   0x3   :  { %17 = vsyncpa [#allocation5], 0  ;;  %s5756_s30 = smov [#allocation6]   ;;  %s5616_s13 = scalar_lea.hbm %s5967_s1, 28672 }
   0x4   :  { %s33_s10 = sshll.u32 %s5756_s30, 4  ;;  %p5617_p0 = scmp.ne.s32.totalorder %s5967_s1, %s5616_s13  ;;  %s34_s10 = int_to_ptr.vmem [resolvable:$true] %s33_s10 }
   0x5   :  { %p5620_p1 = scmp.lt.u32.totalorder %s5616_s13, %s5967_s1 }
   0x7   :  { %p5622_p2 = pnand %p5620_p1, %p5617_p0 }
   0x9   :  { %5625 = shalt.err (!%p5622_p2)
}
   0xa   :  { %s5626_s18 = scalar_lea.vmem %s34_s10, 28672  ;;  %p5631_p4 = scmp.lt.s32.totalorder %s34_s10, %s34_s10 }
   0xb   :  { %p5627_p3 = scmp.ne.s32.totalorder %s34_s10, %s5626_s18  ;;  %p5632_p5 = scmp.lt.s32.totalorder %s5626_s18, %s5626_s18 }
   0xd   :  { %p5633_p6 = por %p5632_p5, %p5631_p4 }
   0xf   :  { %p5634_p7 = pnand %p5633_p6, %p5627_p3 }
  0x11   :  { %5637 = shalt.err (!%p5634_p7)
}
  0x12   :  { %s5757_s19 = smov 256   ;;  %s5758_s20 = smov 16  }
  0x13   :  { %39 = dma.hbm_to_vmem [thread:$0]  %s5967_s1, 28672, %s34_s10, [#allocation7], %s5757_s19, %s5757_s19, %s5758_s20  }
  0x14   :  { %s5759_s23 = smov [#allocation9]   ;;  %s5760_s25 = smov [#allocation3]  }
  0x15   :  { %s61_s24 = sshll.u32 %s5759_s23, 4  ;;  %s24_s26 = sshll.u32 %s5760_s25, 4  ;;  %s62_s24 = int_to_ptr.vmem [resolvable:$true] %s61_s24  ;;  %s25_s26 = int_to_ptr.vmem [resolvable:$true] %s24_s26 }
  0x16   :  { %s5638_s29 = scalar_lea.hbm %s5971_s5, 16384 }
  0x17   :  { %p5639_p8 = scmp.ne.s32.totalorder %s5971_s5, %s5638_s29  ;;  %p5642_p9 = scmp.lt.u32.totalorder %s5638_s29, %s5971_s5 }
  0x19   :  { %p5644_p10 = pnand %p5642_p9, %p5639_p8 }
  0x1b   :  { %5647 = shalt.err (!%p5644_p10)
}
  0x1c   :  { %s5648_s1 = scalar_lea.vmem %s62_s24, 16384  ;;  %p5653_p12 = scmp.lt.s32.totalorder %s62_s24, %s62_s24 }
  0x1d   :  { %p5649_p11 = scmp.ne.s32.totalorder %s62_s24, %s5648_s1  ;;  %p5654_p13 = scmp.lt.s32.totalorder %s5648_s1, %s5648_s1 }
  0x1f   :  { %p5655_p0 = por %p5654_p13, %p5653_p12 }
  0x21   :  { %p5656_p1 = pnand %p5655_p0, %p5649_p11 }
  0x23   :  { %5659 = shalt.err (!%p5656_p1)
}
  0x24   :  { %67 = dma.hbm_to_vmem [thread:$0]  %s5971_s5, 16384, %s62_s24, [#allocation10], %s5757_s19, %s5757_s19, %s5758_s20  }
  0x25   :  { %s5660_s17 = scalar_lea.hbm %s5966_s0, 448 }
  0x26   :  { %p5661_p2 = scmp.ne.s32.totalorder %s5966_s0, %s5660_s17  ;;  %p5664_p3 = scmp.lt.u32.totalorder %s5660_s17, %s5966_s0 }
  0x28   :  { %p5666_p4 = pnand %p5664_p3, %p5661_p2 }
  0x2a   :  { %5669 = shalt.err (!%p5666_p4)
}
  0x2b   :  { %s5670_s25 = scalar_lea.vmem %s25_s26, 448  ;;  %p5675_p6 = scmp.lt.s32.totalorder %s25_s26, %s25_s26 }
  0x2c   :  { %p5671_p5 = scmp.ne.s32.totalorder %s25_s26, %s5670_s25  ;;  %p5676_p7 = scmp.lt.s32.totalorder %s5670_s25, %s5670_s25 }
  0x2e   :  { %p5677_p8 = por %p5676_p7, %p5675_p6 }
  0x30   :  { %p5678_p9 = pnand %p5677_p8, %p5671_p5 }
  0x32   :  { %5681 = shalt.err (!%p5678_p9)
}
  0x33   :  { %27 = dma.hbm_to_vmem [thread:$0]  %s5966_s0, 448, %s25_s26, [#allocation4]  }
  0x34   :  { %s5761_s27 = smov [#allocation8]   ;;  %s5762_s29 = smov [#allocation11]  }
  0x35   :  { %s47_s28 = sshll.u32 %s5761_s27, 4  ;;  %s75_s30 = sshll.u32 %s5762_s29, 4  ;;  %s48_s28 = int_to_ptr.vmem [resolvable:$true] %s47_s28  ;;  %s76_s30 = int_to_ptr.vmem [resolvable:$true] %s75_s30 }
  0x36   :  { %s5682_s13 = scalar_lea.hbm %s5969_s3, 16384 }
  0x37   :  { %p5683_p10 = scmp.ne.s32.totalorder %s5969_s3, %s5682_s13  ;;  %p5686_p11 = scmp.lt.u32.totalorder %s5682_s13, %s5969_s3 }
  0x39   :  { %p5688_p12 = pnand %p5686_p11, %p5683_p10 }
  0x3b   :  { %5691 = shalt.err (!%p5688_p12)
}
  0x3c   :  { %s5692_s0 = scalar_lea.vmem %s48_s28, 16384  ;;  %p5697_p0 = scmp.lt.s32.totalorder %s48_s28, %s48_s28 }
  0x3d   :  { %p5693_p13 = scmp.ne.s32.totalorder %s48_s28, %s5692_s0  ;;  %p5698_p1 = scmp.lt.s32.totalorder %s5692_s0, %s5692_s0 }
  0x3f   :  { %p5699_p2 = por %p5698_p1, %p5697_p0 }
  0x41   :  { %p5700_p3 = pnand %p5699_p2, %p5693_p13 }
  0x43   :  { %5703 = shalt.err (!%p5700_p3)
}
  0x44   :  { %53 = dma.hbm_to_vmem [thread:$0]  %s5969_s3, 16384, %s48_s28, [#allocation7], %s5757_s19, %s5757_s19, %s5758_s20  }
  0x45   :  { %s5704_s21 = scalar_lea.hbm %s5973_s7, 4096 }
  0x46   :  { %p5705_p4 = scmp.ne.s32.totalorder %s5973_s7, %s5704_s21  ;;  %p5708_p5 = scmp.lt.u32.totalorder %s5704_s21, %s5973_s7 }
  0x48   :  { %p5710_p6 = pnand %p5708_p5, %p5705_p4 }
  0x4a   :  { %5713 = shalt.err (!%p5710_p6)
}
  0x4b   :  { %s5714_s24 = scalar_lea.vmem %s76_s30, 4096  ;;  %p5719_p8 = scmp.lt.s32.totalorder %s76_s30, %s76_s30 }
  0x4c   :  { %p5715_p7 = scmp.ne.s32.totalorder %s76_s30, %s5714_s24  ;;  %p5720_p9 = scmp.lt.s32.totalorder %s5714_s24, %s5714_s24 }
  0x4e   :  { %p5721_p10 = por %p5720_p9, %p5719_p8 }
  0x50   :  { %p5722_p11 = pnand %p5721_p10, %p5715_p7 }
  0x52   :  { %5725 = shalt.err (!%p5722_p11)
}
  0x53   :  { %s5763_s3 = smov 64   ;;  %s5764_s19 = smov 4  }
  0x54   :  { %81 = dma.hbm_to_vmem [thread:$0]  %s5973_s7, 4096, %s76_s30, [#allocation10], %s5763_s3, %s5763_s3, %s5764_s19  }
  0x55   :  { %5748 = dma.done.wait [#allocation4], 448  }
  0x56   :  { %5749 = vsyncadd [#allocation4], 4294966848 }
  0x57   :  { %5750 = dma.done.wait [#allocation7], 45056  }
  0x58   :  { %5751 = vsyncadd [#allocation7], 4294922240 }
  0x59   :  { %5752 = dma.done.wait [#allocation10], 20480  }
  0x5a   :  { %5753 = vsyncadd [#allocation10], 4294946816  ;;  %v4857_v0 = vld [vmem:[#allocation6 + $0x4] ss:$16 sps:$4 sm:$0xff]   ;;  %v4859_v1 = vld [vmem:[#allocation6 + $0xc] ss:$16 sps:$4 sm:$0xff]  }
  0x5b   :  { %1495 = vmatprep.subr.bf16.mxu0 %v4857_v0  ;;  %v4861_v2 = vld [vmem:[#allocation6] ss:$16 sps:$4 sm:$0xff]   ;;  %v4862_v3 = vld [vmem:[#allocation6 + $0x8] ss:$16 sps:$4 sm:$0xff]   ;;  %1659 = vmatprep.subr.bf16.mxu1 %v4859_v1  ;;  %v4863_v4 = vld [vmem:[#allocation6 + $0x24] ss:$16 sps:$4 sm:$0xff]  }
  0x5c   :  { %1496 = vmatpush1.bf16.msra.mxu0 %v4861_v2  ;;  %1660 = vmatpush1.bf16.msra.mxu1 %v4862_v3  ;;  %v4865_v5 = vld [vmem:[#allocation6 + $0x2c] ss:$16 sps:$4 sm:$0xff]   ;;  %v4867_v6 = vld [vmem:[#allocation6 + $0x20] ss:$16 sps:$4 sm:$0xff]   ;;  %v4868_v7 = vld [vmem:[#allocation6 + $0x28] ss:$16 sps:$4 sm:$0xff]  }
  0x5d   :  { %1497 = vmatprep.subr.bf16.mxu0 %v4863_v4  ;;  %1661 = vmatprep.subr.bf16.mxu1 %v4865_v5  ;;  %v4869_v8 = vld [vmem:[#allocation6 + $0x44] ss:$16 sps:$4 sm:$0xff]   ;;  %v4871_v9 = vld [vmem:[#allocation6 + $0x4c] ss:$16 sps:$4 sm:$0xff]   ;;  %v4873_v10 = vld [vmem:[#allocation6 + $0x40] ss:$16 sps:$4 sm:$0xff]  }
  0x5e   :  { %v4874_v11 = vld [vmem:[#allocation6 + $0x48] ss:$16 sps:$4 sm:$0xff]   ;;  %v4875_v12 = vld [vmem:[#allocation6 + $0x64] ss:$16 sps:$4 sm:$0xff]   ;;  %v4877_v13 = vld [vmem:[#allocation6 + $0x6c] ss:$16 sps:$4 sm:$0xff]  }
  0x5f   :  { %v4879_v14 = vld [vmem:[#allocation6 + $0x60] ss:$16 sps:$4 sm:$0xff]   ;;  %v4880_v15 = vld [vmem:[#allocation6 + $0x68] ss:$16 sps:$4 sm:$0xff]   ;;  %v4881_v16 = vld [vmem:[#allocation6 + $0x84] ss:$16 sps:$4 sm:$0xff]  }
  0x60   :  { %1498 = vmatpush1.bf16.msra.mxu0 %v4867_v6  ;;  %1662 = vmatpush1.bf16.msra.mxu1 %v4868_v7  ;;  %v4883_v17 = vld [vmem:[#allocation6 + $0x8c] ss:$16 sps:$4 sm:$0xff]   ;;  %v4885_v18 = vld [vmem:[#allocation6 + $0x80] ss:$16 sps:$4 sm:$0xff]   ;;  %v4886_v19 = vld [vmem:[#allocation6 + $0x88] ss:$16 sps:$4 sm:$0xff]  }
  0x61   :  { %1499 = vmatprep.subr.bf16.mxu0 %v4869_v8  ;;  %1663 = vmatprep.subr.bf16.mxu1 %v4871_v9  ;;  %v4887_v20 = vld [vmem:[#allocation6 + $0xa4] ss:$16 sps:$4 sm:$0xff]   ;;  %v4889_v21 = vld [vmem:[#allocation6 + $0xac] ss:$16 sps:$4 sm:$0xff]   ;;  %v4891_v22 = vld [vmem:[#allocation6 + $0xa0] ss:$16 sps:$4 sm:$0xff]  }
  0x62   :  { %v4892_v23 = vld [vmem:[#allocation6 + $0xa8] ss:$16 sps:$4 sm:$0xff]   ;;  %v4893_v24 = vld [vmem:[#allocation6 + $0xc4] ss:$16 sps:$4 sm:$0xff]   ;;  %v4895_v25 = vld [vmem:[#allocation6 + $0xcc] ss:$16 sps:$4 sm:$0xff]  }
  0x63   :  { %v4897_v26 = vld [vmem:[#allocation6 + $0xc0] ss:$16 sps:$4 sm:$0xff]   ;;  %v4898_v27 = vld [vmem:[#allocation6 + $0xc8] ss:$16 sps:$4 sm:$0xff]   ;;  %v4899_v28 = vld [vmem:[#allocation6 + $0xe4] ss:$16 sps:$4 sm:$0xff]  }
  0x64   :  { %1500 = vmatpush1.bf16.msra.mxu0 %v4873_v10  ;;  %1664 = vmatpush1.bf16.msra.mxu1 %v4874_v11  ;;  %v4901_v29 = vld [vmem:[#allocation6 + $0xec] ss:$16 sps:$4 sm:$0xff]   ;;  %v4903_v30 = vld [vmem:[#allocation6 + $0xe0] ss:$16 sps:$4 sm:$0xff]   ;;  %v4904_v31 = vld [vmem:[#allocation6 + $0xe8] ss:$16 sps:$4 sm:$0xff]  }
  0x65   :  { %1501 = vmatprep.subr.bf16.mxu0 %v4875_v12  ;;  %1665 = vmatprep.subr.bf16.mxu1 %v4877_v13  ;;  %v4905_v32 = vld [vmem:[#allocation6 + $0x104] ss:$16 sps:$4 sm:$0xff]   ;;  %v4907_v33 = vld [vmem:[#allocation6 + $0x10c] ss:$16 sps:$4 sm:$0xff]   ;;  %v4909_v34 = vld [vmem:[#allocation6 + $0x100] ss:$16 sps:$4 sm:$0xff]  }
  0x66   :  { %v4910_v35 = vld [vmem:[#allocation6 + $0x108] ss:$16 sps:$4 sm:$0xff]   ;;  %v4911_v36 = vld [vmem:[#allocation6 + $0x124] ss:$16 sps:$4 sm:$0xff]   ;;  %v4913_v37 = vld [vmem:[#allocation6 + $0x12c] ss:$16 sps:$4 sm:$0xff]  }
  0x67   :  { %v4915_v38 = vld [vmem:[#allocation6 + $0x120] ss:$16 sps:$4 sm:$0xff]   ;;  %v4916_v39 = vld [vmem:[#allocation6 + $0x128] ss:$16 sps:$4 sm:$0xff]   ;;  %v4917_v40 = vld [vmem:[#allocation6 + $0x144] ss:$16 sps:$4 sm:$0xff]  }
  0x68   :  { %1502 = vmatpush1.bf16.msra.mxu0 %v4879_v14  ;;  %1666 = vmatpush1.bf16.msra.mxu1 %v4880_v15  ;;  %v4919_v41 = vld [vmem:[#allocation6 + $0x14c] ss:$16 sps:$4 sm:$0xff]   ;;  %v4921_v42 = vld [vmem:[#allocation6 + $0x140] ss:$16 sps:$4 sm:$0xff]   ;;  %v4922_v43 = vld [vmem:[#allocation6 + $0x148] ss:$16 sps:$4 sm:$0xff]  }
  0x69   :  { %1503 = vmatprep.subr.bf16.mxu0 %v4881_v16  ;;  %1667 = vmatprep.subr.bf16.mxu1 %v4883_v17  ;;  %v4923_v44 = vld [vmem:[#allocation6 + $0x164] ss:$16 sps:$4 sm:$0xff]   ;;  %v4925_v45 = vld [vmem:[#allocation6 + $0x16c] ss:$16 sps:$4 sm:$0xff]   ;;  %v4927_v47 = vld [vmem:[#allocation6 + $0x160] ss:$16 sps:$4 sm:$0xff]  }
  0x6a   :  { %v100_v46 = vld [vmem:[#allocation3] sm:$0xff]  ;;  %v4931_v51 = vld [vmem:[#allocation6 + $0x18c] ss:$16 sps:$4 sm:$0xff]   ;;  %v4933_v52 = vld [vmem:[#allocation6 + $0x180] ss:$16 sps:$4 sm:$0xff]   ;;  %s5766_s12 = smov [#allocation12]  }
  0x6b   :  { %v4195_v48 = vcombine.high %v100_v46, %v100_v46  ;;  %v4928_v49 = vld [vmem:[#allocation6 + $0x168] ss:$16 sps:$4 sm:$0xff]   ;;  %v4929_v50 = vld [vmem:[#allocation6 + $0x184] ss:$16 sps:$4 sm:$0xff]   ;;  %v4937_v55 = vld [vmem:[#allocation6 + $0x1ac] ss:$16 sps:$4 sm:$0xff]   ;;  %v4194_v4 = vcombine.low %v100_v46, %v100_v46 }
  0x6c   :  { %1504 = vmatpush1.bf16.msra.mxu0 %v4885_v18  ;;  %1668 = vmatpush1.bf16.msra.mxu1 %v4886_v19  ;;  %v4934_v53 = vld [vmem:[#allocation6 + $0x188] ss:$16 sps:$4 sm:$0xff]   ;;  %v4935_v54 = vld [vmem:[#allocation6 + $0x1a4] ss:$16 sps:$4 sm:$0xff]   ;;  %v4939_v56 = vld [vmem:[#allocation6 + $0x1a0] ss:$16 sps:$4 sm:$0xff]  }
  0x6d   :  { %1505 = vmatprep.subr.bf16.mxu0 %v4887_v20  ;;  %1669 = vmatprep.subr.bf16.mxu1 %v4889_v21  ;;  %v4940_v57 = vld [vmem:[#allocation6 + $0x1a8] ss:$16 sps:$4 sm:$0xff]   ;;  %v4941_v58 = vld [vmem:[#allocation6 + $0x1c4] ss:$16 sps:$4 sm:$0xff]   ;;  %v4943_v59 = vld [vmem:[#allocation6 + $0x1cc] ss:$16 sps:$4 sm:$0xff]  }
  0x6e   :  { %1527 = vmatprep.mubr.bf16.mxu0 %v4195_v48  ;;  %1691 = vmatprep.mubr.bf16.mxu1 %v4195_v48  ;;  %v4945_v60 = vld [vmem:[#allocation6 + $0x1c0] ss:$16 sps:$4 sm:$0xff]   ;;  %v4946_v61 = vld [vmem:[#allocation6 + $0x1c8] ss:$16 sps:$4 sm:$0xff]   ;;  %v4947_v62 = vld [vmem:[#allocation6 + $0x1e4] ss:$16 sps:$4 sm:$0xff]  }
  0x6f   :  { %v4949_v63 = vld [vmem:[#allocation6 + $0x1ec] ss:$16 sps:$4 sm:$0xff]   ;;  %v4951_v0 = vld [vmem:[#allocation6 + $0x1e0] ss:$16 sps:$4 sm:$0xff]   ;;  %v4952_v1 = vld [vmem:[#allocation6 + $0x1e8] ss:$16 sps:$4 sm:$0xff]  }
  0x70   :  { %1506 = vmatpush1.bf16.msra.mxu0 %v4891_v22  ;;  %1670 = vmatpush1.bf16.msra.mxu1 %v4892_v23  ;;  %v4957_v2 = vld [vmem:[#allocation6 + $0x204] ss:$16 sps:$4 sm:$0xff]   ;;  %v4960_v3 = vld [vmem:[#allocation6 + $0x20c] ss:$16 sps:$4 sm:$0xff]   ;;  %v4955_v5 = vld [vmem:[#allocation6 + $0x200] ss:$16 sps:$4 sm:$0xff]  }
  0x71   :  { %1507 = vmatprep.subr.bf16.mxu0 %v4893_v24  ;;  %1671 = vmatprep.subr.bf16.mxu1 %v4895_v25  ;;  %v4958_v6 = vld [vmem:[#allocation6 + $0x208] ss:$16 sps:$4 sm:$0xff]   ;;  %v4963_v7 = vld [vmem:[#allocation6 + $0x224] ss:$16 sps:$4 sm:$0xff]   ;;  %v4966_v8 = vld [vmem:[#allocation6 + $0x22c] ss:$16 sps:$4 sm:$0xff]  }
  0x72   :  { %v4961_v9 = vld [vmem:[#allocation6 + $0x220] ss:$16 sps:$4 sm:$0xff]   ;;  %v4964_v10 = vld [vmem:[#allocation6 + $0x228] ss:$16 sps:$4 sm:$0xff]   ;;  %v4969_v11 = vld [vmem:[#allocation6 + $0x244] ss:$16 sps:$4 sm:$0xff]  }
  0x73   :  { %v4972_v12 = vld [vmem:[#allocation6 + $0x24c] ss:$16 sps:$4 sm:$0xff]   ;;  %v4967_v13 = vld [vmem:[#allocation6 + $0x240] ss:$16 sps:$4 sm:$0xff]   ;;  %v4970_v14 = vld [vmem:[#allocation6 + $0x248] ss:$16 sps:$4 sm:$0xff]  }
  0x74   :  { %1508 = vmatpush1.bf16.msra.mxu0 %v4897_v26  ;;  %1672 = vmatpush1.bf16.msra.mxu1 %v4898_v27  ;;  %v4975_v15 = vld [vmem:[#allocation6 + $0x264] ss:$16 sps:$4 sm:$0xff]   ;;  %v4978_v16 = vld [vmem:[#allocation6 + $0x26c] ss:$16 sps:$4 sm:$0xff]   ;;  %v4973_v17 = vld [vmem:[#allocation6 + $0x260] ss:$16 sps:$4 sm:$0xff]  }
  0x75   :  { %1509 = vmatprep.subr.bf16.mxu0 %v4899_v28  ;;  %1673 = vmatprep.subr.bf16.mxu1 %v4901_v29  ;;  %v4976_v18 = vld [vmem:[#allocation6 + $0x268] ss:$16 sps:$4 sm:$0xff]   ;;  %v4981_v19 = vld [vmem:[#allocation6 + $0x284] ss:$16 sps:$4 sm:$0xff]   ;;  %v4984_v20 = vld [vmem:[#allocation6 + $0x28c] ss:$16 sps:$4 sm:$0xff]  }
  0x76   :  { %v4979_v21 = vld [vmem:[#allocation6 + $0x280] ss:$16 sps:$4 sm:$0xff]   ;;  %v4982_v22 = vld [vmem:[#allocation6 + $0x288] ss:$16 sps:$4 sm:$0xff]   ;;  %v4987_v23 = vld [vmem:[#allocation6 + $0x2a4] ss:$16 sps:$4 sm:$0xff]  }
  0x77   :  { %v4990_v24 = vld [vmem:[#allocation6 + $0x2ac] ss:$16 sps:$4 sm:$0xff]   ;;  %v4985_v25 = vld [vmem:[#allocation6 + $0x2a0] ss:$16 sps:$4 sm:$0xff]   ;;  %v4988_v26 = vld [vmem:[#allocation6 + $0x2a8] ss:$16 sps:$4 sm:$0xff]  }
  0x78   :  { %1510 = vmatpush1.bf16.msra.mxu0 %v4903_v30  ;;  %1674 = vmatpush1.bf16.msra.mxu1 %v4904_v31  ;;  %v4993_v27 = vld [vmem:[#allocation6 + $0x2c4] ss:$16 sps:$4 sm:$0xff]   ;;  %v4996_v28 = vld [vmem:[#allocation6 + $0x2cc] ss:$16 sps:$4 sm:$0xff]   ;;  %v4991_v31 = vld [vmem:[#allocation6 + $0x2c0] ss:$16 sps:$4 sm:$0xff]  }
  0x79   :  { %1511 = vmatprep.subr.bf16.mxu0 %v4905_v32  ;;  %1675 = vmatprep.subr.bf16.mxu1 %v4907_v33  ;;  %v5886_v29 = vld [vmem:[#allocation3 + $0x8] sm:$0xff]  ;;  %v4994_v32 = vld [vmem:[#allocation6 + $0x2c8] ss:$16 sps:$4 sm:$0xff]   ;;  %v4999_v33 = vld [vmem:[#allocation6 + $0x2e4] ss:$16 sps:$4 sm:$0xff]   ;;  %s4183_s13 = sshll.u32 %s5766_s12, 4  ;;  %s4184_s13 = int_to_ptr.vmem [resolvable:$true] %s4183_s13 }
  0x7a   :  { %v4197_v30 = vcombine.high %v5886_v29, %v5886_v29  ;;  %v5020_v46 = vld [vmem:[#allocation6 + $0x34c] ss:$16 sps:$4 sm:$0xff]   ;;  %v5018_v48 = vld [vmem:[#allocation6 + $0x348] ss:$16 sps:$4 sm:$0xff]   ;;  %s5726_s1 = scalar_lea.vmem %s4184_s13, 128  ;;  %p5731_p13 = scmp.lt.s32.totalorder %s4184_s13, %s4184_s13 }
  0x7b   :  { %p5727_p12 = scmp.ne.s32.totalorder %s4184_s13, %s5726_s1  ;;  %p5732_p0 = scmp.lt.s32.totalorder %s5726_s1, %s5726_s1 }
  0x7c   :  { %1512 = vmatpush1.bf16.msra.mxu0 %v4909_v34  ;;  %1676 = vmatpush1.bf16.msra.mxu1 %v4910_v35  ;;  %v5002_v34 = vld [vmem:[#allocation6 + $0x2ec] ss:$16 sps:$4 sm:$0xff]   ;;  %v4997_v35 = vld [vmem:[#allocation6 + $0x2e0] ss:$16 sps:$4 sm:$0xff]  }
  0x7d   :  { %1513 = vmatprep.subr.bf16.mxu0 %v4911_v36  ;;  %1677 = vmatprep.subr.bf16.mxu1 %v4913_v37  ;;  %v5000_v36 = vld [vmem:[#allocation6 + $0x2e8] ss:$16 sps:$4 sm:$0xff]   ;;  %v5005_v37 = vld [vmem:[#allocation6 + $0x304] ss:$16 sps:$4 sm:$0xff]   ;;  %p5733_p1 = por %p5732_p0, %p5731_p13 }
  0x7f   :  { %p5734_p2 = pnand %p5733_p1, %p5727_p12 }
  0x80   :  { %1514 = vmatpush1.bf16.msra.mxu0 %v4915_v38  ;;  %1678 = vmatpush1.bf16.msra.mxu1 %v4916_v39  ;;  %v5008_v38 = vld [vmem:[#allocation6 + $0x30c] ss:$16 sps:$4 sm:$0xff]   ;;  %v5003_v39 = vld [vmem:[#allocation6 + $0x300] ss:$16 sps:$4 sm:$0xff]  }
  0x81   :  { %1515 = vmatprep.subr.bf16.mxu0 %v4917_v40  ;;  %1679 = vmatprep.subr.bf16.mxu1 %v4919_v41  ;;  %v5006_v40 = vld [vmem:[#allocation6 + $0x308] ss:$16 sps:$4 sm:$0xff]   ;;  %v5011_v41 = vld [vmem:[#allocation6 + $0x324] ss:$16 sps:$4 sm:$0xff]  }
  0x84   :  { %1516 = vmatpush1.bf16.msra.mxu0 %v4921_v42  ;;  %1680 = vmatpush1.bf16.msra.mxu1 %v4922_v43  ;;  %v5014_v42 = vld [vmem:[#allocation6 + $0x32c] ss:$16 sps:$4 sm:$0xff]   ;;  %v5009_v43 = vld [vmem:[#allocation6 + $0x320] ss:$16 sps:$4 sm:$0xff]  }
  0x85   :  { %1517 = vmatprep.subr.bf16.mxu0 %v4923_v44  ;;  %1681 = vmatprep.subr.bf16.mxu1 %v4925_v45  ;;  %v5012_v44 = vld [vmem:[#allocation6 + $0x328] ss:$16 sps:$4 sm:$0xff]   ;;  %v5017_v45 = vld [vmem:[#allocation6 + $0x344] ss:$16 sps:$4 sm:$0xff]  }
  0x88   :  { %1518 = vmatpush1.bf16.msra.mxu0 %v4927_v47  ;;  %1682 = vmatpush1.bf16.msra.mxu1 %v4928_v49  ;;  %v5015_v47 = vld [vmem:[#allocation6 + $0x340] ss:$16 sps:$4 sm:$0xff]   ;;  %v5023_v49 = vld [vmem:[#allocation6 + $0x364] ss:$16 sps:$4 sm:$0xff]  }
  0x89   :  { %1519 = vmatprep.subr.bf16.mxu0 %v4929_v50  ;;  %1683 = vmatprep.subr.bf16.mxu1 %v4931_v51  ;;  %v5026_v50 = vld [vmem:[#allocation6 + $0x36c] ss:$16 sps:$4 sm:$0xff]   ;;  %v5021_v51 = vld [vmem:[#allocation6 + $0x360] ss:$16 sps:$4 sm:$0xff]  }
  0x8c   :  { %1520 = vmatpush1.bf16.msra.mxu0 %v4933_v52  ;;  %1684 = vmatpush1.bf16.msra.mxu1 %v4934_v53  ;;  %v5024_v52 = vld [vmem:[#allocation6 + $0x368] ss:$16 sps:$4 sm:$0xff]   ;;  %v5029_v53 = vld [vmem:[#allocation6 + $0x384] ss:$16 sps:$4 sm:$0xff]  }
  0x8d   :  { %1521 = vmatprep.subr.bf16.mxu0 %v4935_v54  ;;  %1685 = vmatprep.subr.bf16.mxu1 %v4937_v55  ;;  %v5032_v54 = vld [vmem:[#allocation6 + $0x38c] ss:$16 sps:$4 sm:$0xff]   ;;  %v5027_v55 = vld [vmem:[#allocation6 + $0x380] ss:$16 sps:$4 sm:$0xff]  }
  0x90   :  { %1522 = vmatpush1.bf16.msra.mxu0 %v4939_v56  ;;  %1686 = vmatpush1.bf16.msra.mxu1 %v4940_v57  ;;  %v5030_v56 = vld [vmem:[#allocation6 + $0x388] ss:$16 sps:$4 sm:$0xff]   ;;  %v5035_v57 = vld [vmem:[#allocation6 + $0x3a4] ss:$16 sps:$4 sm:$0xff]  }
  0x91   :  { %1523 = vmatprep.subr.bf16.mxu0 %v4941_v58  ;;  %1687 = vmatprep.subr.bf16.mxu1 %v4943_v59  ;;  %v5038_v58 = vld [vmem:[#allocation6 + $0x3ac] ss:$16 sps:$4 sm:$0xff]   ;;  %v5033_v59 = vld [vmem:[#allocation6 + $0x3a0] ss:$16 sps:$4 sm:$0xff]  }
  0x94   :  { %1524 = vmatpush1.bf16.msra.mxu0 %v4945_v60  ;;  %1688 = vmatpush1.bf16.msra.mxu1 %v4946_v61  ;;  %v5036_v60 = vld [vmem:[#allocation6 + $0x3a8] ss:$16 sps:$4 sm:$0xff]   ;;  %v5041_v61 = vld [vmem:[#allocation6 + $0x3c4] ss:$16 sps:$4 sm:$0xff]  }
  0x95   :  { %1525 = vmatprep.subr.bf16.mxu0 %v4947_v62  ;;  %1689 = vmatprep.subr.bf16.mxu1 %v4949_v63  ;;  %v5044_v62 = vld [vmem:[#allocation6 + $0x3cc] ss:$16 sps:$4 sm:$0xff]   ;;  %v5039_v63 = vld [vmem:[#allocation6 + $0x3c0] ss:$16 sps:$4 sm:$0xff]  }
  0x98   :  { %1526 = vmatpush1.bf16.msra.mxu0 %v4951_v0  ;;  %1690 = vmatpush1.bf16.msra.mxu1 %v4952_v1  ;;  %v5042_v0 = vld [vmem:[#allocation6 + $0x3c8] ss:$16 sps:$4 sm:$0xff]   ;;  %v5047_v1 = vld [vmem:[#allocation6 + $0x3e4] ss:$16 sps:$4 sm:$0xff]  }
  0x99   :  { %1536 = vmatprep.subr.bf16.mxu0 %v4957_v2  ;;  %1700 = vmatprep.subr.bf16.mxu1 %v4960_v3  ;;  %v5050_v2 = vld [vmem:[#allocation6 + $0x3ec] ss:$16 sps:$4 sm:$0xff]   ;;  %v5045_v3 = vld [vmem:[#allocation6 + $0x3e0] ss:$16 sps:$4 sm:$0xff]  }
  0x9b   :  { %1528 = vmatmul.mubr.bf16.vlgmr.msra.gmra.mrb[0].mxu0 %v4194_v4  ;;  %1692 = vmatmul.mubr.bf16.vlgmr.msra.gmra.mrb[0].mxu1 %v4194_v4  ;;  %v5048_v4 = vld [vmem:[#allocation6 + $0x3e8] ss:$16 sps:$4 sm:$0xff]  }
  0x9c   :  { %1537 = vmatpush1.bf16.msra.mxu0 %v4955_v5  ;;  %1701 = vmatpush1.bf16.msra.mxu1 %v4958_v6  ;;  %v5055_v5 = vld [vmem:[#allocation6 + $0x404] ss:$16 sps:$4 sm:$0xff]   ;;  %v5058_v6 = vld [vmem:[#allocation6 + $0x40c] ss:$16 sps:$4 sm:$0xff]  }
  0x9d   :  { %1538 = vmatprep.subr.bf16.mxu0 %v4963_v7  ;;  %1702 = vmatprep.subr.bf16.mxu1 %v4966_v8  ;;  %v4196_v7 = vcombine.low %v5886_v29, %v5886_v29  ;;  %v5053_v8 = vld [vmem:[#allocation6 + $0x400] ss:$16 sps:$4 sm:$0xff]   ;;  %v5088_v29 = vld [vmem:[#allocation6 + $0x4ac] ss:$16 sps:$4 sm:$0xff]  }
  0x9e   :  { %1568 = vmatprep.mubr.bf16.mxu0 %v4197_v30  ;;  %1732 = vmatprep.mubr.bf16.mxu1 %v4197_v30  ;;  %v5083_v30 = vld [vmem:[#allocation6 + $0x4a0] ss:$16 sps:$4 sm:$0xff]  }
  0xa0   :  { %1539 = vmatpush1.bf16.msra.mxu0 %v4961_v9  ;;  %1703 = vmatpush1.bf16.msra.mxu1 %v4964_v10  ;;  %v5056_v9 = vld [vmem:[#allocation6 + $0x408] ss:$16 sps:$4 sm:$0xff]   ;;  %v5061_v10 = vld [vmem:[#allocation6 + $0x424] ss:$16 sps:$4 sm:$0xff]  }
  0xa1   :  { %1540 = vmatprep.subr.bf16.mxu0 %v4969_v11  ;;  %1704 = vmatprep.subr.bf16.mxu1 %v4972_v12  ;;  %v5892_v11 = vld [vmem:[#allocation3 + $0x10] sm:$0xff]  ;;  %v5064_v12 = vld [vmem:[#allocation6 + $0x42c] ss:$16 sps:$4 sm:$0xff]  }
  0xa4   :  { %1541 = vmatpush1.bf16.msra.mxu0 %v4967_v13  ;;  %1705 = vmatpush1.bf16.msra.mxu1 %v4970_v14  ;;  %v4199_v13 = vcombine.high %v5892_v11, %v5892_v11  ;;  %v5059_v14 = vld [vmem:[#allocation6 + $0x420] ss:$16 sps:$4 sm:$0xff]  }
  0xa5   :  { %1542 = vmatprep.subr.bf16.mxu0 %v4975_v15  ;;  %1706 = vmatprep.subr.bf16.mxu1 %v4978_v16  ;;  %v5062_v15 = vld [vmem:[#allocation6 + $0x428] ss:$16 sps:$4 sm:$0xff]   ;;  %v5067_v16 = vld [vmem:[#allocation6 + $0x444] ss:$16 sps:$4 sm:$0xff]  }
  0xa8   :  { %1543 = vmatpush1.bf16.msra.mxu0 %v4973_v17  ;;  %1707 = vmatpush1.bf16.msra.mxu1 %v4976_v18  ;;  %v5070_v17 = vld [vmem:[#allocation6 + $0x44c] ss:$16 sps:$4 sm:$0xff]   ;;  %v5065_v18 = vld [vmem:[#allocation6 + $0x440] ss:$16 sps:$4 sm:$0xff]  }
  0xa9   :  { %1544 = vmatprep.subr.bf16.mxu0 %v4981_v19  ;;  %1708 = vmatprep.subr.bf16.mxu1 %v4984_v20  ;;  %v5068_v19 = vld [vmem:[#allocation6 + $0x448] ss:$16 sps:$4 sm:$0xff]   ;;  %v5073_v20 = vld [vmem:[#allocation6 + $0x464] ss:$16 sps:$4 sm:$0xff]  }
  0xac   :  { %1545 = vmatpush1.bf16.msra.mxu0 %v4979_v21  ;;  %1709 = vmatpush1.bf16.msra.mxu1 %v4982_v22  ;;  %v5076_v21 = vld [vmem:[#allocation6 + $0x46c] ss:$16 sps:$4 sm:$0xff]   ;;  %v5071_v22 = vld [vmem:[#allocation6 + $0x460] ss:$16 sps:$4 sm:$0xff]  }
  0xad   :  { %1546 = vmatprep.subr.bf16.mxu0 %v4987_v23  ;;  %1710 = vmatprep.subr.bf16.mxu1 %v4990_v24  ;;  %v5074_v23 = vld [vmem:[#allocation6 + $0x468] ss:$16 sps:$4 sm:$0xff]   ;;  %v5079_v24 = vld [vmem:[#allocation6 + $0x484] ss:$16 sps:$4 sm:$0xff]  }
  0xb0   :  { %1547 = vmatpush1.bf16.msra.mxu0 %v4985_v25  ;;  %1711 = vmatpush1.bf16.msra.mxu1 %v4988_v26  ;;  %v5082_v25 = vld [vmem:[#allocation6 + $0x48c] ss:$16 sps:$4 sm:$0xff]   ;;  %v5077_v26 = vld [vmem:[#allocation6 + $0x480] ss:$16 sps:$4 sm:$0xff]  }
  0xb1   :  { %1548 = vmatprep.subr.bf16.mxu0 %v4993_v27  ;;  %1712 = vmatprep.subr.bf16.mxu1 %v4996_v28  ;;  %v5080_v27 = vld [vmem:[#allocation6 + $0x488] ss:$16 sps:$4 sm:$0xff]   ;;  %v5085_v28 = vld [vmem:[#allocation6 + $0x4a4] ss:$16 sps:$4 sm:$0xff]  }
  0xb4   :  { %1549 = vmatpush1.bf16.msra.mxu0 %v4991_v31  ;;  %1713 = vmatpush1.bf16.msra.mxu1 %v4994_v32  ;;  %v5086_v31 = vld [vmem:[#allocation6 + $0x4a8] ss:$16 sps:$4 sm:$0xff]   ;;  %v5091_v32 = vld [vmem:[#allocation6 + $0x4c4] ss:$16 sps:$4 sm:$0xff]  }
  0xb5   :  { %1550 = vmatprep.subr.bf16.mxu0 %v4999_v33  ;;  %1714 = vmatprep.subr.bf16.mxu1 %v5002_v34  ;;  %v5094_v33 = vld [vmem:[#allocation6 + $0x4cc] ss:$16 sps:$4 sm:$0xff]   ;;  %v5089_v34 = vld [vmem:[#allocation6 + $0x4c0] ss:$16 sps:$4 sm:$0xff]  }
  0xb8   :  { %1551 = vmatpush1.bf16.msra.mxu0 %v4997_v35  ;;  %1715 = vmatpush1.bf16.msra.mxu1 %v5000_v36  ;;  %v5092_v35 = vld [vmem:[#allocation6 + $0x4c8] ss:$16 sps:$4 sm:$0xff]   ;;  %v5097_v36 = vld [vmem:[#allocation6 + $0x4e4] ss:$16 sps:$4 sm:$0xff]  }
  0xb9   :  { %1552 = vmatprep.subr.bf16.mxu0 %v5005_v37  ;;  %1716 = vmatprep.subr.bf16.mxu1 %v5008_v38  ;;  %v5100_v37 = vld [vmem:[#allocation6 + $0x4ec] ss:$16 sps:$4 sm:$0xff]   ;;  %v5095_v38 = vld [vmem:[#allocation6 + $0x4e0] ss:$16 sps:$4 sm:$0xff]  }
  0xbc   :  { %1553 = vmatpush1.bf16.msra.mxu0 %v5003_v39  ;;  %1717 = vmatpush1.bf16.msra.mxu1 %v5006_v40  ;;  %v5098_v39 = vld [vmem:[#allocation6 + $0x4e8] ss:$16 sps:$4 sm:$0xff]   ;;  %v5103_v40 = vld [vmem:[#allocation6 + $0x504] ss:$16 sps:$4 sm:$0xff]  }
  0xbd   :  { %1554 = vmatprep.subr.bf16.mxu0 %v5011_v41  ;;  %1718 = vmatprep.subr.bf16.mxu1 %v5014_v42  ;;  %v5106_v41 = vld [vmem:[#allocation6 + $0x50c] ss:$16 sps:$4 sm:$0xff]   ;;  %v5101_v42 = vld [vmem:[#allocation6 + $0x500] ss:$16 sps:$4 sm:$0xff]  }
  0xc0   :  { %1555 = vmatpush1.bf16.msra.mxu0 %v5009_v43  ;;  %1719 = vmatpush1.bf16.msra.mxu1 %v5012_v44  ;;  %v5104_v43 = vld [vmem:[#allocation6 + $0x508] ss:$16 sps:$4 sm:$0xff]   ;;  %v5109_v44 = vld [vmem:[#allocation6 + $0x524] ss:$16 sps:$4 sm:$0xff]  }
  0xc1   :  { %1556 = vmatprep.subr.bf16.mxu0 %v5017_v45  ;;  %1720 = vmatprep.subr.bf16.mxu1 %v5020_v46  ;;  %v5112_v45 = vld [vmem:[#allocation6 + $0x52c] ss:$16 sps:$4 sm:$0xff]   ;;  %v5107_v46 = vld [vmem:[#allocation6 + $0x520] ss:$16 sps:$4 sm:$0xff]  }
  0xc4   :  { %1557 = vmatpush1.bf16.msra.mxu0 %v5015_v47  ;;  %1721 = vmatpush1.bf16.msra.mxu1 %v5018_v48  ;;  %v5110_v47 = vld [vmem:[#allocation6 + $0x528] ss:$16 sps:$4 sm:$0xff]   ;;  %v5115_v48 = vld [vmem:[#allocation6 + $0x544] ss:$16 sps:$4 sm:$0xff]  }
  0xc5   :  { %1558 = vmatprep.subr.bf16.mxu0 %v5023_v49  ;;  %1722 = vmatprep.subr.bf16.mxu1 %v5026_v50  ;;  %v5118_v49 = vld [vmem:[#allocation6 + $0x54c] ss:$16 sps:$4 sm:$0xff]   ;;  %v5113_v50 = vld [vmem:[#allocation6 + $0x540] ss:$16 sps:$4 sm:$0xff]  }
  0xc8   :  { %1559 = vmatpush1.bf16.msra.mxu0 %v5021_v51  ;;  %1723 = vmatpush1.bf16.msra.mxu1 %v5024_v52  ;;  %v5116_v51 = vld [vmem:[#allocation6 + $0x548] ss:$16 sps:$4 sm:$0xff]   ;;  %v5121_v52 = vld [vmem:[#allocation6 + $0x564] ss:$16 sps:$4 sm:$0xff]  }
  0xc9   :  { %1560 = vmatprep.subr.bf16.mxu0 %v5029_v53  ;;  %1724 = vmatprep.subr.bf16.mxu1 %v5032_v54  ;;  %v5124_v53 = vld [vmem:[#allocation6 + $0x56c] ss:$16 sps:$4 sm:$0xff]   ;;  %v5119_v54 = vld [vmem:[#allocation6 + $0x560] ss:$16 sps:$4 sm:$0xff]  }
  0xcc   :  { %1561 = vmatpush1.bf16.msra.mxu0 %v5027_v55  ;;  %1725 = vmatpush1.bf16.msra.mxu1 %v5030_v56  ;;  %v5122_v55 = vld [vmem:[#allocation6 + $0x568] ss:$16 sps:$4 sm:$0xff]   ;;  %v5127_v56 = vld [vmem:[#allocation6 + $0x584] ss:$16 sps:$4 sm:$0xff]  }
  0xcd   :  { %1562 = vmatprep.subr.bf16.mxu0 %v5035_v57  ;;  %1726 = vmatprep.subr.bf16.mxu1 %v5038_v58  ;;  %v5130_v57 = vld [vmem:[#allocation6 + $0x58c] ss:$16 sps:$4 sm:$0xff]   ;;  %v5125_v58 = vld [vmem:[#allocation6 + $0x580] ss:$16 sps:$4 sm:$0xff]  }
  0xd0   :  { %1563 = vmatpush1.bf16.msra.mxu0 %v5033_v59  ;;  %1727 = vmatpush1.bf16.msra.mxu1 %v5036_v60  ;;  %v5128_v59 = vld [vmem:[#allocation6 + $0x588] ss:$16 sps:$4 sm:$0xff]   ;;  %v5133_v60 = vld [vmem:[#allocation6 + $0x5a4] ss:$16 sps:$4 sm:$0xff]  }
  0xd1   :  { %1564 = vmatprep.subr.bf16.mxu0 %v5041_v61  ;;  %1728 = vmatprep.subr.bf16.mxu1 %v5044_v62  ;;  %v5136_v61 = vld [vmem:[#allocation6 + $0x5ac] ss:$16 sps:$4 sm:$0xff]   ;;  %v5131_v62 = vld [vmem:[#allocation6 + $0x5a0] ss:$16 sps:$4 sm:$0xff]  }
  0xd4   :  { %1565 = vmatpush1.bf16.msra.mxu0 %v5039_v63  ;;  %1729 = vmatpush1.bf16.msra.mxu1 %v5042_v0  ;;  %v5134_v63 = vld [vmem:[#allocation6 + $0x5a8] ss:$16 sps:$4 sm:$0xff]   ;;  %v5139_v0 = vld [vmem:[#allocation6 + $0x5c4] ss:$16 sps:$4 sm:$0xff]  }
  0xd5   :  { %1566 = vmatprep.subr.bf16.mxu0 %v5047_v1  ;;  %1730 = vmatprep.subr.bf16.mxu1 %v5050_v2  ;;  %v5142_v1 = vld [vmem:[#allocation6 + $0x5cc] ss:$16 sps:$4 sm:$0xff]   ;;  %v5137_v2 = vld [vmem:[#allocation6 + $0x5c0] ss:$16 sps:$4 sm:$0xff]  }
  0xd8   :  { %1567 = vmatpush1.bf16.msra.mxu0 %v5045_v3  ;;  %1731 = vmatpush1.bf16.msra.mxu1 %v5048_v4  ;;  %v5140_v3 = vld [vmem:[#allocation6 + $0x5c8] ss:$16 sps:$4 sm:$0xff]   ;;  %v5145_v4 = vld [vmem:[#allocation6 + $0x5e4] ss:$16 sps:$4 sm:$0xff]  }
  0xd9   :  { %1577 = vmatprep.subr.bf16.mxu0 %v5055_v5  ;;  %1741 = vmatprep.subr.bf16.mxu1 %v5058_v6  ;;  %v5148_v5 = vld [vmem:[#allocation6 + $0x5ec] ss:$16 sps:$4 sm:$0xff]   ;;  %v5143_v6 = vld [vmem:[#allocation6 + $0x5e0] ss:$16 sps:$4 sm:$0xff]  }
  0xdb   :  { %1569 = vmatmul.mubr.bf16.vlgmr.msra.gmra.mrb[0].mxu0 %v4196_v7  ;;  %1733 = vmatmul.mubr.bf16.vlgmr.msra.gmra.mrb[0].mxu1 %v4196_v7  ;;  %v5146_v7 = vld [vmem:[#allocation6 + $0x5e8] ss:$16 sps:$4 sm:$0xff]  }
  0xdc   :  { %1578 = vmatpush1.bf16.msra.mxu0 %v5053_v8  ;;  %1742 = vmatpush1.bf16.msra.mxu1 %v5056_v9  ;;  %v5153_v8 = vld [vmem:[#allocation6 + $0x604] ss:$16 sps:$4 sm:$0xff]   ;;  %v5156_v9 = vld [vmem:[#allocation6 + $0x60c] ss:$16 sps:$4 sm:$0xff]  }
  0xdd   :  { %1579 = vmatprep.subr.bf16.mxu0 %v5061_v10  ;;  %1743 = vmatprep.subr.bf16.mxu1 %v5064_v12  ;;  %v5151_v10 = vld [vmem:[#allocation6 + $0x600] ss:$16 sps:$4 sm:$0xff]   ;;  %v5154_v12 = vld [vmem:[#allocation6 + $0x608] ss:$16 sps:$4 sm:$0xff]  }
  0xde   :  { %1609 = vmatprep.mubr.bf16.mxu0 %v4199_v13  ;;  %1773 = vmatprep.mubr.bf16.mxu1 %v4199_v13  ;;  %v4198_v13 = vcombine.low %v5892_v11, %v5892_v11  ;;  %v5171_v11 = vld [vmem:[#allocation6 + $0x664] ss:$16 sps:$4 sm:$0xff]  }
  0xe0   :  { %1580 = vmatpush1.bf16.msra.mxu0 %v5059_v14  ;;  %1744 = vmatpush1.bf16.msra.mxu1 %v5062_v15  ;;  %v5159_v14 = vld [vmem:[#allocation6 + $0x624] ss:$16 sps:$4 sm:$0xff]   ;;  %v5162_v15 = vld [vmem:[#allocation6 + $0x62c] ss:$16 sps:$4 sm:$0xff]  }
  0xe1   :  { %1581 = vmatprep.subr.bf16.mxu0 %v5067_v16  ;;  %1745 = vmatprep.subr.bf16.mxu1 %v5070_v17  ;;  %v5157_v16 = vld [vmem:[#allocation6 + $0x620] ss:$16 sps:$4 sm:$0xff]   ;;  %v5160_v17 = vld [vmem:[#allocation6 + $0x628] ss:$16 sps:$4 sm:$0xff]  }
  0xe4   :  { %1582 = vmatpush1.bf16.msra.mxu0 %v5065_v18  ;;  %1746 = vmatpush1.bf16.msra.mxu1 %v5068_v19  ;;  %v5165_v18 = vld [vmem:[#allocation6 + $0x644] ss:$16 sps:$4 sm:$0xff]   ;;  %v5168_v19 = vld [vmem:[#allocation6 + $0x64c] ss:$16 sps:$4 sm:$0xff]  }
  0xe5   :  { %1583 = vmatprep.subr.bf16.mxu0 %v5073_v20  ;;  %1747 = vmatprep.subr.bf16.mxu1 %v5076_v21  ;;  %v5163_v20 = vld [vmem:[#allocation6 + $0x640] ss:$16 sps:$4 sm:$0xff]   ;;  %v5166_v21 = vld [vmem:[#allocation6 + $0x648] ss:$16 sps:$4 sm:$0xff]  }
  0xe8   :  { %1584 = vmatpush1.bf16.msra.mxu0 %v5071_v22  ;;  %1748 = vmatpush1.bf16.msra.mxu1 %v5074_v23  ;;  %v5765_v22 = vmov 0   ;;  %v5174_v23 = vld [vmem:[#allocation6 + $0x66c] ss:$16 sps:$4 sm:$0xff]  }
  0xe9   :  { %1585 = vmatprep.subr.bf16.mxu0 %v5079_v24  ;;  %1749 = vmatprep.subr.bf16.mxu1 %v5082_v25  ;;  %v5169_v24 = vld [vmem:[#allocation6 + $0x660] ss:$16 sps:$4 sm:$0xff]   ;;  %v5172_v25 = vld [vmem:[#allocation6 + $0x668] ss:$16 sps:$4 sm:$0xff]  }
  0xec   :  { %1586 = vmatpush1.bf16.msra.mxu0 %v5077_v26  ;;  %1750 = vmatpush1.bf16.msra.mxu1 %v5080_v27  ;;  %v5177_v26 = vld [vmem:[#allocation6 + $0x684] ss:$16 sps:$4 sm:$0xff]   ;;  %v5180_v27 = vld [vmem:[#allocation6 + $0x68c] ss:$16 sps:$4 sm:$0xff]  }
  0xed   :  { %1587 = vmatprep.subr.bf16.mxu0 %v5085_v28  ;;  %1751 = vmatprep.subr.bf16.mxu1 %v5088_v29  ;;  %v5175_v28 = vld [vmem:[#allocation6 + $0x680] ss:$16 sps:$4 sm:$0xff]   ;;  %v5178_v29 = vld [vmem:[#allocation6 + $0x688] ss:$16 sps:$4 sm:$0xff]  }
  0xf0   :  { %1588 = vmatpush1.bf16.msra.mxu0 %v5083_v30  ;;  %1752 = vmatpush1.bf16.msra.mxu1 %v5086_v31  ;;  %v5183_v30 = vld [vmem:[#allocation6 + $0x6a4] ss:$16 sps:$4 sm:$0xff]   ;;  %v5186_v31 = vld [vmem:[#allocation6 + $0x6ac] ss:$16 sps:$4 sm:$0xff]  }
  0xf1   :  { %1589 = vmatprep.subr.bf16.mxu0 %v5091_v32  ;;  %1753 = vmatprep.subr.bf16.mxu1 %v5094_v33  ;;  %v5181_v32 = vld [vmem:[#allocation6 + $0x6a0] ss:$16 sps:$4 sm:$0xff]   ;;  %v5184_v33 = vld [vmem:[#allocation6 + $0x6a8] ss:$16 sps:$4 sm:$0xff]  }
  0xf4   :  { %1590 = vmatpush1.bf16.msra.mxu0 %v5089_v34  ;;  %1754 = vmatpush1.bf16.msra.mxu1 %v5092_v35  ;;  %v5189_v34 = vld [vmem:[#allocation6 + $0x6c4] ss:$16 sps:$4 sm:$0xff]   ;;  %v5192_v35 = vld [vmem:[#allocation6 + $0x6cc] ss:$16 sps:$4 sm:$0xff]  }
  0xf5   :  { %1591 = vmatprep.subr.bf16.mxu0 %v5097_v36  ;;  %1755 = vmatprep.subr.bf16.mxu1 %v5100_v37  ;;  %v5187_v36 = vld [vmem:[#allocation6 + $0x6c0] ss:$16 sps:$4 sm:$0xff]   ;;  %v5190_v37 = vld [vmem:[#allocation6 + $0x6c8] ss:$16 sps:$4 sm:$0xff]  }
  0xf8   :  { %1592 = vmatpush1.bf16.msra.mxu0 %v5095_v38  ;;  %1756 = vmatpush1.bf16.msra.mxu1 %v5098_v39  ;;  %v5195_v38 = vld [vmem:[#allocation6 + $0x6e4] ss:$16 sps:$4 sm:$0xff]   ;;  %v5198_v39 = vld [vmem:[#allocation6 + $0x6ec] ss:$16 sps:$4 sm:$0xff]  }
  0xf9   :  { %1593 = vmatprep.subr.bf16.mxu0 %v5103_v40  ;;  %1757 = vmatprep.subr.bf16.mxu1 %v5106_v41  ;;  %v5193_v40 = vld [vmem:[#allocation6 + $0x6e0] ss:$16 sps:$4 sm:$0xff]   ;;  %v5196_v41 = vld [vmem:[#allocation6 + $0x6e8] ss:$16 sps:$4 sm:$0xff]  }
  0xfc   :  { %1594 = vmatpush1.bf16.msra.mxu0 %v5101_v42  ;;  %1758 = vmatpush1.bf16.msra.mxu1 %v5104_v43  ;;  %v5202_v42 = vld [vmem:[#allocation8 + $0x4] ss:$16 sps:$4 sm:$0xff]   ;;  %v5205_v43 = vld [vmem:[#allocation8 + $0xc] ss:$16 sps:$4 sm:$0xff]  }
  0xfd   :  { %1595 = vmatprep.subr.bf16.mxu0 %v5109_v44  ;;  %1759 = vmatprep.subr.bf16.mxu1 %v5112_v45  ;;  %v5199_v44 = vld [vmem:[#allocation3 + $0x18] ss:$0 sps:$4 sm:$0xff]   ;;  %v5200_v45 = vld [vmem:[#allocation8] ss:$16 sps:$4 sm:$0xff]  }
 0x100   :  { %1596 = vmatpush1.bf16.msra.mxu0 %v5107_v46  ;;  %1760 = vmatpush1.bf16.msra.mxu1 %v5110_v47  ;;  %v5203_v46 = vld [vmem:[#allocation8 + $0x8] ss:$16 sps:$4 sm:$0xff]   ;;  %v5208_v47 = vld [vmem:[#allocation8 + $0x24] ss:$16 sps:$4 sm:$0xff]  }
 0x101   :  { %1597 = vmatprep.subr.bf16.mxu0 %v5115_v48  ;;  %1761 = vmatprep.subr.bf16.mxu1 %v5118_v49  ;;  %v5211_v48 = vld [vmem:[#allocation8 + $0x2c] ss:$16 sps:$4 sm:$0xff]   ;;  %v5206_v49 = vld [vmem:[#allocation8 + $0x20] ss:$16 sps:$4 sm:$0xff]  }
 0x104   :  { %1598 = vmatpush1.bf16.msra.mxu0 %v5113_v50  ;;  %1762 = vmatpush1.bf16.msra.mxu1 %v5116_v51  ;;  %v5209_v50 = vld [vmem:[#allocation8 + $0x28] ss:$16 sps:$4 sm:$0xff]   ;;  %v5214_v51 = vld [vmem:[#allocation8 + $0x44] ss:$16 sps:$4 sm:$0xff]  }
 0x105   :  { %1599 = vmatprep.subr.bf16.mxu0 %v5121_v52  ;;  %1763 = vmatprep.subr.bf16.mxu1 %v5124_v53  ;;  %v5217_v52 = vld [vmem:[#allocation8 + $0x4c] ss:$16 sps:$4 sm:$0xff]   ;;  %v5212_v53 = vld [vmem:[#allocation8 + $0x40] ss:$16 sps:$4 sm:$0xff]  }
 0x108   :  { %1600 = vmatpush1.bf16.msra.mxu0 %v5119_v54  ;;  %1764 = vmatpush1.bf16.msra.mxu1 %v5122_v55  ;;  %v5215_v54 = vld [vmem:[#allocation8 + $0x48] ss:$16 sps:$4 sm:$0xff]   ;;  %v5220_v55 = vld [vmem:[#allocation8 + $0x64] ss:$16 sps:$4 sm:$0xff]  }
 0x109   :  { %1601 = vmatprep.subr.bf16.mxu0 %v5127_v56  ;;  %1765 = vmatprep.subr.bf16.mxu1 %v5130_v57  ;;  %v5223_v56 = vld [vmem:[#allocation8 + $0x6c] ss:$16 sps:$4 sm:$0xff]   ;;  %v5218_v57 = vld [vmem:[#allocation8 + $0x60] ss:$16 sps:$4 sm:$0xff]  }
 0x10c   :  { %1602 = vmatpush1.bf16.msra.mxu0 %v5125_v58  ;;  %1766 = vmatpush1.bf16.msra.mxu1 %v5128_v59  ;;  %v5221_v58 = vld [vmem:[#allocation8 + $0x68] ss:$16 sps:$4 sm:$0xff]   ;;  %v5226_v59 = vld [vmem:[#allocation8 + $0x84] ss:$16 sps:$4 sm:$0xff]  }
 0x10d   :  { %1603 = vmatprep.subr.bf16.mxu0 %v5133_v60  ;;  %1767 = vmatprep.subr.bf16.mxu1 %v5136_v61  ;;  %v5229_v60 = vld [vmem:[#allocation8 + $0x8c] ss:$16 sps:$4 sm:$0xff]   ;;  %v5224_v61 = vld [vmem:[#allocation8 + $0x80] ss:$16 sps:$4 sm:$0xff]  }
 0x110   :  { %1604 = vmatpush1.bf16.msra.mxu0 %v5131_v62  ;;  %1768 = vmatpush1.bf16.msra.mxu1 %v5134_v63  ;;  %v5227_v62 = vld [vmem:[#allocation8 + $0x88] ss:$16 sps:$4 sm:$0xff]   ;;  %v5232_v63 = vld [vmem:[#allocation8 + $0xa4] ss:$16 sps:$4 sm:$0xff]  }
 0x111   :  { %1605 = vmatprep.subr.bf16.mxu0 %v5139_v0  ;;  %1769 = vmatprep.subr.bf16.mxu1 %v5142_v1  ;;  %v5235_v0 = vld [vmem:[#allocation8 + $0xac] ss:$16 sps:$4 sm:$0xff]   ;;  %v5230_v1 = vld [vmem:[#allocation8 + $0xa0] ss:$16 sps:$4 sm:$0xff]  }
 0x114   :  { %1606 = vmatpush1.bf16.msra.mxu0 %v5137_v2  ;;  %1770 = vmatpush1.bf16.msra.mxu1 %v5140_v3  ;;  %v5233_v2 = vld [vmem:[#allocation8 + $0xa8] ss:$16 sps:$4 sm:$0xff]   ;;  %v5238_v3 = vld [vmem:[#allocation8 + $0xc4] ss:$16 sps:$4 sm:$0xff]  }
 0x115   :  { %1607 = vmatprep.subr.bf16.mxu0 %v5145_v4  ;;  %1771 = vmatprep.subr.bf16.mxu1 %v5148_v5  ;;  %v5241_v4 = vld [vmem:[#allocation8 + $0xcc] ss:$16 sps:$4 sm:$0xff]   ;;  %v5236_v5 = vld [vmem:[#allocation8 + $0xc0] ss:$16 sps:$4 sm:$0xff]  }
 0x118   :  { %1608 = vmatpush1.bf16.msra.mxu0 %v5143_v6  ;;  %1772 = vmatpush1.bf16.msra.mxu1 %v5146_v7  ;;  %v5239_v6 = vld [vmem:[#allocation8 + $0xc8] ss:$16 sps:$4 sm:$0xff]   ;;  %v5244_v7 = vld [vmem:[#allocation8 + $0xe4] ss:$16 sps:$4 sm:$0xff]  }
 0x119   :  { %1618 = vmatprep.subr.bf16.mxu0 %v5153_v8  ;;  %1782 = vmatprep.subr.bf16.mxu1 %v5156_v9  ;;  %v5247_v8 = vld [vmem:[#allocation8 + $0xec] ss:$16 sps:$4 sm:$0xff]   ;;  %v5242_v9 = vld [vmem:[#allocation8 + $0xe0] ss:$16 sps:$4 sm:$0xff]  }
 0x11b   :  { %1610 = vmatmul.mubr.bf16.vlgmr.msra.gmra.mrb[0].mxu0 %v4198_v13  ;;  %1774 = vmatmul.mubr.bf16.vlgmr.msra.gmra.mrb[0].mxu1 %v4198_v13  ;;  %v5253_v13 = vld [vmem:[#allocation8 + $0x10c] ss:$16 sps:$4 sm:$0xff]  }
 0x11c   :  { %1619 = vmatpush1.bf16.msra.mxu0 %v5151_v10  ;;  %1783 = vmatpush1.bf16.msra.mxu1 %v5154_v12  ;;  %v5245_v10 = vld [vmem:[#allocation8 + $0xe8] ss:$16 sps:$4 sm:$0xff]   ;;  %v5250_v12 = vld [vmem:[#allocation8 + $0x104] ss:$16 sps:$4 sm:$0xff]  }
 0x11d   :  { %1620 = vmatprep.subr.bf16.mxu0 %v5159_v14  ;;  %1784 = vmatprep.subr.bf16.mxu1 %v5162_v15  ;;  %v5248_v14 = vld [vmem:[#allocation8 + $0x100] ss:$16 sps:$4 sm:$0xff]   ;;  %v5251_v15 = vld [vmem:[#allocation8 + $0x108] ss:$16 sps:$4 sm:$0xff]  }
 0x11e   :  { %1650 = vmatprep.mubr.bf16.mxu0 %v5765_v22  ;;  %1814 = vmatprep.mubr.bf16.mxu1 %v5765_v22  ;;  %v5260_v22 = vld [vmem:[#allocation8 + $0x140] ss:$16 sps:$4 sm:$0xff]  }
 0x120   :  { %1621 = vmatpush1.bf16.msra.mxu0 %v5157_v16  ;;  %1785 = vmatpush1.bf16.msra.mxu1 %v5160_v17  ;;  %v5256_v16 = vld [vmem:[#allocation8 + $0x124] ss:$16 sps:$4 sm:$0xff]   ;;  %v5259_v17 = vld [vmem:[#allocation8 + $0x12c] ss:$16 sps:$4 sm:$0xff]  }
 0x121   :  { %1622 = vmatprep.subr.bf16.mxu0 %v5165_v18  ;;  %1786 = vmatprep.subr.bf16.mxu1 %v5168_v19  ;;  %v5254_v18 = vld [vmem:[#allocation8 + $0x120] ss:$16 sps:$4 sm:$0xff]   ;;  %v5257_v19 = vld [vmem:[#allocation8 + $0x128] ss:$16 sps:$4 sm:$0xff]  }
 0x124   :  { %1623 = vmatpush1.bf16.msra.mxu0 %v5163_v20  ;;  %1787 = vmatpush1.bf16.msra.mxu1 %v5166_v21  ;;  %v5262_v20 = vld [vmem:[#allocation8 + $0x144] ss:$16 sps:$4 sm:$0xff]   ;;  %v5265_v21 = vld [vmem:[#allocation8 + $0x14c] ss:$16 sps:$4 sm:$0xff]  }
 0x125   :  { %1624 = vmatprep.subr.bf16.mxu0 %v5171_v11  ;;  %1788 = vmatprep.subr.bf16.mxu1 %v5174_v23  ;;  %v5263_v11 = vld [vmem:[#allocation8 + $0x148] ss:$16 sps:$4 sm:$0xff]   ;;  %v5268_v23 = vld [vmem:[#allocation8 + $0x164] ss:$16 sps:$4 sm:$0xff]  }
 0x128   :  { %1625 = vmatpush1.bf16.msra.mxu0 %v5169_v24  ;;  %1789 = vmatpush1.bf16.msra.mxu1 %v5172_v25  ;;  %v5271_v24 = vld [vmem:[#allocation8 + $0x16c] ss:$16 sps:$4 sm:$0xff]   ;;  %v5266_v25 = vld [vmem:[#allocation8 + $0x160] ss:$16 sps:$4 sm:$0xff]  }
 0x129   :  { %1626 = vmatprep.subr.bf16.mxu0 %v5177_v26  ;;  %1790 = vmatprep.subr.bf16.mxu1 %v5180_v27  ;;  %v5269_v26 = vld [vmem:[#allocation8 + $0x168] ss:$16 sps:$4 sm:$0xff]   ;;  %v5274_v27 = vld [vmem:[#allocation8 + $0x184] ss:$16 sps:$4 sm:$0xff]  }
 0x12c   :  { %1627 = vmatpush1.bf16.msra.mxu0 %v5175_v28  ;;  %1791 = vmatpush1.bf16.msra.mxu1 %v5178_v29  ;;  %v5277_v28 = vld [vmem:[#allocation8 + $0x18c] ss:$16 sps:$4 sm:$0xff]   ;;  %v5272_v29 = vld [vmem:[#allocation8 + $0x180] ss:$16 sps:$4 sm:$0xff]  }
 0x12d   :  { %1628 = vmatprep.subr.bf16.mxu0 %v5183_v30  ;;  %1792 = vmatprep.subr.bf16.mxu1 %v5186_v31  ;;  %v5275_v30 = vld [vmem:[#allocation8 + $0x188] ss:$16 sps:$4 sm:$0xff]   ;;  %v5280_v31 = vld [vmem:[#allocation8 + $0x1a4] ss:$16 sps:$4 sm:$0xff]  }
 0x130   :  { %1629 = vmatpush1.bf16.msra.mxu0 %v5181_v32  ;;  %1793 = vmatpush1.bf16.msra.mxu1 %v5184_v33  ;;  %v5283_v32 = vld [vmem:[#allocation8 + $0x1ac] ss:$16 sps:$4 sm:$0xff]   ;;  %v5278_v33 = vld [vmem:[#allocation8 + $0x1a0] ss:$16 sps:$4 sm:$0xff]  }
 0x131   :  { %1630 = vmatprep.subr.bf16.mxu0 %v5189_v34  ;;  %1794 = vmatprep.subr.bf16.mxu1 %v5192_v35  ;;  %v5281_v34 = vld [vmem:[#allocation8 + $0x1a8] ss:$16 sps:$4 sm:$0xff]   ;;  %v5286_v35 = vld [vmem:[#allocation8 + $0x1c4] ss:$16 sps:$4 sm:$0xff]  }
 0x134   :  { %1631 = vmatpush1.bf16.msra.mxu0 %v5187_v36  ;;  %1795 = vmatpush1.bf16.msra.mxu1 %v5190_v37  ;;  %v5289_v36 = vld [vmem:[#allocation8 + $0x1cc] ss:$16 sps:$4 sm:$0xff]   ;;  %v5284_v37 = vld [vmem:[#allocation8 + $0x1c0] ss:$16 sps:$4 sm:$0xff]  }
 0x135   :  { %1632 = vmatprep.subr.bf16.mxu0 %v5195_v38  ;;  %1796 = vmatprep.subr.bf16.mxu1 %v5198_v39  ;;  %v5287_v38 = vld [vmem:[#allocation8 + $0x1c8] ss:$16 sps:$4 sm:$0xff]   ;;  %v5292_v39 = vld [vmem:[#allocation8 + $0x1e4] ss:$16 sps:$4 sm:$0xff]  }
 0x138   :  { %1633 = vmatpush1.bf16.msra.mxu0 %v5193_v40  ;;  %1797 = vmatpush1.bf16.msra.mxu1 %v5196_v41  ;;  %v5295_v40 = vld [vmem:[#allocation8 + $0x1ec] ss:$16 sps:$4 sm:$0xff]   ;;  %v5290_v41 = vld [vmem:[#allocation8 + $0x1e0] ss:$16 sps:$4 sm:$0xff]  }
 0x139   :  { %2647 = vmatprep.subr.bf16.mxu0 %v5202_v42  ;;  %2729 = vmatprep.subr.bf16.mxu1 %v5205_v43  ;;  %v5293_v42 = vld [vmem:[#allocation8 + $0x1e8] ss:$16 sps:$4 sm:$0xff]   ;;  %v5298_v43 = vld [vmem:[#allocation8 + $0x204] ss:$16 sps:$4 sm:$0xff]  }
 0x13b   :  { %1651 = vmatmul.mubr.bf16.vlgmr.msra.gmra.mrb[0].mxu0 %v5199_v44  ;;  %1815 = vmatmul.mubr.bf16.vlgmr.msra.gmra.mrb[0].mxu1 %v5199_v44  ;;  %v5301_v44 = vld [vmem:[#allocation8 + $0x20c] ss:$16 sps:$4 sm:$0xff]  }
 0x13c   :  { %2648 = vmatpush1.bf16.msra.mxu0 %v5200_v45  ;;  %2730 = vmatpush1.bf16.msra.mxu1 %v5203_v46  ;;  %v330_v45 = vlaneseq }
 0x13d   :  { %2649 = vmatprep.subr.bf16.mxu0 %v5208_v47  ;;  %2731 = vmatprep.subr.bf16.mxu1 %v5211_v48  ;;  %v5906_v48 = vld [vmem:[%s5968_s2] sm:$0xf] }
 0x13e   :  { %v5898_v46 = vshrl.u32 %v330_v45, 7  ;;  %v5359_v45 = vld [vmem:[#allocation8 + $0x348] ss:$16 sps:$4 sm:$0xff]  }
 0x140   :  { %2650 = vmatpush1.bf16.msra.mxu0 %v5206_v49  ;;  %2732 = vmatpush1.bf16.msra.mxu1 %v5209_v50  ;;  %v5901_v47 = vsub.s32 0, %v5898_v46  ;;  %v5909_v49 = vsub.s32 1, %v5898_v46  ;;  %v5912_v50 = vsub.s32 3, %v5898_v46 }
 0x141   :  { %2651 = vmatprep.subr.bf16.mxu0 %v5214_v51  ;;  %2733 = vmatprep.subr.bf16.mxu1 %v5217_v52 }
 0x142   :  { %v333_v51 = vrot.slane %v5906_v48, %v5901_v47  ;;  %v337_v52 = vrot.slane %v5906_v48, %v5909_v49 }
 0x144   :  { %2652 = vmatpush1.bf16.msra.mxu0 %v5212_v53  ;;  %2734 = vmatpush1.bf16.msra.mxu1 %v5215_v54  ;;  %v345_v53 = vrot.slane %v5906_v48, %v5912_v50 }
 0x145   :  { %2653 = vmatprep.subr.bf16.mxu0 %v5220_v55  ;;  %2735 = vmatprep.subr.bf16.mxu1 %v5223_v56 }
 0x148   :  { %2654 = vmatpush1.bf16.msra.mxu0 %v5218_v57  ;;  %2736 = vmatpush1.bf16.msra.mxu1 %v5221_v58 }
 0x149   :  { %2655 = vmatprep.subr.bf16.mxu0 %v5226_v59  ;;  %2737 = vmatprep.subr.bf16.mxu1 %v5229_v60 }
 0x14c   :  { %2656 = vmatpush1.bf16.msra.mxu0 %v5224_v61  ;;  %2738 = vmatpush1.bf16.msra.mxu1 %v5227_v62 }
 0x14d   :  { %2657 = vmatprep.subr.bf16.mxu0 %v5232_v63  ;;  %2739 = vmatprep.subr.bf16.mxu1 %v5235_v0 }
 0x150   :  { %2658 = vmatpush1.bf16.msra.mxu0 %v5230_v1  ;;  %2740 = vmatpush1.bf16.msra.mxu1 %v5233_v2  ;;  %v5296_v2 = vld [vmem:[#allocation8 + $0x200] ss:$16 sps:$4 sm:$0xff]  }
 0x151   :  { %2659 = vmatprep.subr.bf16.mxu0 %v5238_v3  ;;  %2741 = vmatprep.subr.bf16.mxu1 %v5241_v4  ;;  %v5299_v3 = vld [vmem:[#allocation8 + $0x208] ss:$16 sps:$4 sm:$0xff]  }
 0x154   :  { %2660 = vmatpush1.bf16.msra.mxu0 %v5236_v5  ;;  %2742 = vmatpush1.bf16.msra.mxu1 %v5239_v6  ;;  %v5304_v5 = vld [vmem:[#allocation8 + $0x224] ss:$16 sps:$4 sm:$0xff]   ;;  %v5307_v6 = vld [vmem:[#allocation8 + $0x22c] ss:$16 sps:$4 sm:$0xff]  }
 0x155   :  { %2661 = vmatprep.subr.bf16.mxu0 %v5244_v7  ;;  %2743 = vmatprep.subr.bf16.mxu1 %v5247_v8  ;;  %v5302_v8 = vld [vmem:[#allocation8 + $0x220] ss:$16 sps:$4 sm:$0xff]  }
 0x158   :  { %2662 = vmatpush1.bf16.msra.mxu0 %v5242_v9  ;;  %2744 = vmatpush1.bf16.msra.mxu1 %v5245_v10  ;;  %v5305_v9 = vld [vmem:[#allocation8 + $0x228] ss:$16 sps:$4 sm:$0xff]   ;;  %v5310_v10 = vld [vmem:[#allocation8 + $0x244] ss:$16 sps:$4 sm:$0xff]  }
 0x159   :  { %2663 = vmatprep.subr.bf16.mxu0 %v5250_v12  ;;  %2745 = vmatprep.subr.bf16.mxu1 %v5253_v13  ;;  %v5313_v12 = vld [vmem:[#allocation8 + $0x24c] ss:$16 sps:$4 sm:$0xff]   ;;  %v5308_v13 = vld [vmem:[#allocation8 + $0x240] ss:$16 sps:$4 sm:$0xff]  }
 0x15c   :  { %2664 = vmatpush1.bf16.msra.mxu0 %v5248_v14  ;;  %2746 = vmatpush1.bf16.msra.mxu1 %v5251_v15  ;;  %v5311_v14 = vld [vmem:[#allocation8 + $0x248] ss:$16 sps:$4 sm:$0xff]   ;;  %v5316_v15 = vld [vmem:[#allocation8 + $0x264] ss:$16 sps:$4 sm:$0xff]  }
 0x15d   :  { %2665 = vmatprep.subr.bf16.mxu0 %v5256_v16  ;;  %2747 = vmatprep.subr.bf16.mxu1 %v5259_v17  ;;  %v5319_v16 = vld [vmem:[#allocation8 + $0x26c] ss:$16 sps:$4 sm:$0xff]   ;;  %v5314_v17 = vld [vmem:[#allocation8 + $0x260] ss:$16 sps:$4 sm:$0xff]  }
 0x160   :  { %2666 = vmatpush1.bf16.msra.mxu0 %v5254_v18  ;;  %2748 = vmatpush1.bf16.msra.mxu1 %v5257_v19  ;;  %v5317_v18 = vld [vmem:[#allocation8 + $0x268] ss:$16 sps:$4 sm:$0xff]   ;;  %v5322_v19 = vld [vmem:[#allocation8 + $0x284] ss:$16 sps:$4 sm:$0xff]  }
 0x161   :  { %2667 = vmatprep.subr.bf16.mxu0 %v5262_v20  ;;  %2749 = vmatprep.subr.bf16.mxu1 %v5265_v21  ;;  %v5325_v20 = vld [vmem:[#allocation8 + $0x28c] ss:$16 sps:$4 sm:$0xff]   ;;  %v5320_v21 = vld [vmem:[#allocation8 + $0x280] ss:$16 sps:$4 sm:$0xff]  }
 0x164   :  { %2668 = vmatpush1.bf16.msra.mxu0 %v5260_v22  ;;  %2750 = vmatpush1.bf16.msra.mxu1 %v5263_v11  ;;  %v5323_v22 = vld [vmem:[#allocation8 + $0x288] ss:$16 sps:$4 sm:$0xff]   ;;  %v5328_v11 = vld [vmem:[#allocation8 + $0x2a4] ss:$16 sps:$4 sm:$0xff]  }
 0x165   :  { %2669 = vmatprep.subr.bf16.mxu0 %v5268_v23  ;;  %2751 = vmatprep.subr.bf16.mxu1 %v5271_v24  ;;  %v5331_v23 = vld [vmem:[#allocation8 + $0x2ac] ss:$16 sps:$4 sm:$0xff]   ;;  %v5326_v24 = vld [vmem:[#allocation8 + $0x2a0] ss:$16 sps:$4 sm:$0xff]  }
 0x168   :  { %2670 = vmatpush1.bf16.msra.mxu0 %v5266_v25  ;;  %2752 = vmatpush1.bf16.msra.mxu1 %v5269_v26  ;;  %v5329_v25 = vld [vmem:[#allocation8 + $0x2a8] ss:$16 sps:$4 sm:$0xff]   ;;  %v5334_v26 = vld [vmem:[#allocation8 + $0x2c4] ss:$16 sps:$4 sm:$0xff]  }
 0x169   :  { %2671 = vmatprep.subr.bf16.mxu0 %v5274_v27  ;;  %2753 = vmatprep.subr.bf16.mxu1 %v5277_v28  ;;  %v5337_v27 = vld [vmem:[#allocation8 + $0x2cc] ss:$16 sps:$4 sm:$0xff]   ;;  %v5332_v28 = vld [vmem:[#allocation8 + $0x2c0] ss:$16 sps:$4 sm:$0xff]  }
 0x16c   :  { %2672 = vmatpush1.bf16.msra.mxu0 %v5272_v29  ;;  %2754 = vmatpush1.bf16.msra.mxu1 %v5275_v30  ;;  %v5335_v29 = vld [vmem:[#allocation8 + $0x2c8] ss:$16 sps:$4 sm:$0xff]   ;;  %v5340_v30 = vld [vmem:[#allocation8 + $0x2e4] ss:$16 sps:$4 sm:$0xff]  }
 0x16d   :  { %2673 = vmatprep.subr.bf16.mxu0 %v5280_v31  ;;  %2755 = vmatprep.subr.bf16.mxu1 %v5283_v32  ;;  %v5343_v31 = vld [vmem:[#allocation8 + $0x2ec] ss:$16 sps:$4 sm:$0xff]   ;;  %v5338_v32 = vld [vmem:[#allocation8 + $0x2e0] ss:$16 sps:$4 sm:$0xff]  }
 0x170   :  { %2674 = vmatpush1.bf16.msra.mxu0 %v5278_v33  ;;  %2756 = vmatpush1.bf16.msra.mxu1 %v5281_v34  ;;  %v5341_v33 = vld [vmem:[#allocation8 + $0x2e8] ss:$16 sps:$4 sm:$0xff]   ;;  %v5346_v34 = vld [vmem:[#allocation8 + $0x304] ss:$16 sps:$4 sm:$0xff]  }
 0x171   :  { %2675 = vmatprep.subr.bf16.mxu0 %v5286_v35  ;;  %2757 = vmatprep.subr.bf16.mxu1 %v5289_v36  ;;  %v5349_v35 = vld [vmem:[#allocation8 + $0x30c] ss:$16 sps:$4 sm:$0xff]   ;;  %v5344_v36 = vld [vmem:[#allocation8 + $0x300] ss:$16 sps:$4 sm:$0xff]  }
 0x174   :  { %2676 = vmatpush1.bf16.msra.mxu0 %v5284_v37  ;;  %2758 = vmatpush1.bf16.msra.mxu1 %v5287_v38  ;;  %v5347_v37 = vld [vmem:[#allocation8 + $0x308] ss:$16 sps:$4 sm:$0xff]   ;;  %v5352_v38 = vld [vmem:[#allocation8 + $0x324] ss:$16 sps:$4 sm:$0xff]  }
 0x175   :  { %2677 = vmatprep.subr.bf16.mxu0 %v5292_v39  ;;  %2759 = vmatprep.subr.bf16.mxu1 %v5295_v40  ;;  %v5355_v39 = vld [vmem:[#allocation8 + $0x32c] ss:$16 sps:$4 sm:$0xff]   ;;  %v5350_v40 = vld [vmem:[#allocation8 + $0x320] ss:$16 sps:$4 sm:$0xff]  }
 0x178   :  { %2678 = vmatpush1.bf16.msra.mxu0 %v5290_v41  ;;  %2760 = vmatpush1.bf16.msra.mxu1 %v5293_v42  ;;  %v5353_v41 = vld [vmem:[#allocation8 + $0x328] ss:$16 sps:$4 sm:$0xff]   ;;  %v5358_v42 = vld [vmem:[#allocation8 + $0x344] ss:$16 sps:$4 sm:$0xff]  }
 0x179   :  { %2688 = vmatprep.subr.bf16.mxu0 %v5298_v43  ;;  %2770 = vmatprep.subr.bf16.mxu1 %v5301_v44  ;;  %v5361_v43 = vld [vmem:[#allocation8 + $0x34c] ss:$16 sps:$4 sm:$0xff]   ;;  %v5356_v44 = vld [vmem:[#allocation8 + $0x340] ss:$16 sps:$4 sm:$0xff]  }
 0x20e   :  { %v1652_v54 = vpop.f32.mrb[0].mxu0  ;;  %v5920_v55 = vpop.f32.mrb[0].mxu1 }
 0x20f   :  { %v4794_v56 = vadd.f32 %v1652_v54, %v333_v51  ;;  %v1654_v57 = vpop.f32.mrb[1].mxu0  ;;  %v1818_v58 = vpop.f32.mrb[1].mxu1  ;;  %v5364_v51 = vld [vmem:[#allocation8 + $0x364] ss:$16 sps:$4 sm:$0xff]   ;;  %v5365_v54 = vld [vmem:[#allocation8 + $0x368] ss:$16 sps:$4 sm:$0xff]  }
 0x210   :  { %v4795_v59 = vadd.f32 %v1654_v57, %v337_v52  ;;  %v1656_v60 = vpop.f32.mrb[2].mxu0  ;;  %v1820_v61 = vpop.f32.mrb[2].mxu1  ;;  %v4797_v62 = vadd.f32 %v1818_v58, %v345_v53  ;;  %v5367_v52 = vld [vmem:[#allocation8 + $0x36c] ss:$16 sps:$4 sm:$0xff]   ;;  %v5362_v53 = vld [vmem:[#allocation8 + $0x360] ss:$16 sps:$4 sm:$0xff]  }
 0x211   :  { %v1657_v63 = vpop.f32.mrb[3].mxu0  ;;  %v1821_v0 = vpop.f32.mrb[3].mxu1  ;;  %v4738_v4 = vpack.c.bf16 %v4794_v56, %v4794_v56  ;;  %v5370_v56 = vld [vmem:[#allocation8 + $0x384] ss:$16 sps:$4 sm:$0xff]   ;;  %v5373_v57 = vld [vmem:[#allocation8 + $0x38c] ss:$16 sps:$4 sm:$0xff]  }
 0x212   :  { %v4739_v1 = vpack.c.bf16 %v4795_v59, %v4795_v59  ;;  %v4741_v7 = vpack.c.bf16 %v4797_v62, %v4797_v62  ;;  %v5368_v58 = vld [vmem:[#allocation8 + $0x380] ss:$16 sps:$4 sm:$0xff]   ;;  %v5371_v59 = vld [vmem:[#allocation8 + $0x388] ss:$16 sps:$4 sm:$0xff]   ;;  %v5376_v60 = vld [vmem:[#allocation8 + $0x3a4] ss:$16 sps:$4 sm:$0xff]  }
 0x213   :  { %v5379_v61 = vld [vmem:[#allocation8 + $0x3ac] ss:$16 sps:$4 sm:$0xff]   ;;  %v5374_v62 = vld [vmem:[#allocation8 + $0x3a0] ss:$16 sps:$4 sm:$0xff]   ;;  %v5377_v63 = vld [vmem:[#allocation8 + $0x3a8] ss:$16 sps:$4 sm:$0xff]  }
 0x214   :  { %2679 = vmatprep.mubr.bf16.mxu0 %v4739_v1  ;;  %2761 = vmatprep.mubr.bf16.mxu1 %v4739_v1  ;;  %v5923_v0 = vsub.s32 2, %v5898_v46  ;;  %v5382_v1 = vld [vmem:[#allocation8 + $0x3c4] ss:$16 sps:$4 sm:$0xff]   ;;  %v5389_v46 = vld [vmem:[#allocation8 + $0x3e8] ss:$16 sps:$4 sm:$0xff]  }
 0x215   :  { %2680 = vmatmul.mubr.bf16.vlgmr.msra.gmra.mrb[4].mxu0 %v4738_v4  ;;  %2762 = vmatmul.mubr.bf16.vlgmr.msra.gmra.mrb[4].mxu1 %v4738_v4  ;;  %v5383_v4 = vld [vmem:[#allocation8 + $0x3c8] ss:$16 sps:$4 sm:$0xff]  }
 0x216   :  { %2689 = vmatpush1.bf16.msra.mxu0 %v5296_v2  ;;  %2771 = vmatpush1.bf16.msra.mxu1 %v5299_v3  ;;  %v5385_v2 = vld [vmem:[#allocation8 + $0x3cc] ss:$16 sps:$4 sm:$0xff]   ;;  %v5380_v3 = vld [vmem:[#allocation8 + $0x3c0] ss:$16 sps:$4 sm:$0xff]  }
 0x217   :  { %2720 = vmatprep.mubr.bf16.mxu0 %v4741_v7  ;;  %2802 = vmatprep.mubr.bf16.mxu1 %v4741_v7  ;;  %v5391_v7 = vld [vmem:[#allocation8 + $0x3ec] ss:$16 sps:$4 sm:$0xff]  }
 0x218   :  { %2690 = vmatprep.subr.bf16.mxu0 %v5304_v5  ;;  %2772 = vmatprep.subr.bf16.mxu1 %v5307_v6  ;;  %v341_v5 = vrot.slane %v5906_v48, %v5923_v0  ;;  %v5388_v6 = vld [vmem:[#allocation8 + $0x3e4] ss:$16 sps:$4 sm:$0xff]  }
 0x219   :  { %v5400_v48 = vld [vmem:[#allocation9 + $0x24] ss:$16 sps:$4 sm:$0xff]  }
 0x21a   :  { %2691 = vmatpush1.bf16.msra.mxu0 %v5302_v8  ;;  %2773 = vmatpush1.bf16.msra.mxu1 %v5305_v9  ;;  %v5386_v8 = vld [vmem:[#allocation8 + $0x3e0] ss:$16 sps:$4 sm:$0xff]   ;;  %v4796_v9 = vadd.f32 %v5920_v55, %v341_v5  ;;  %v5406_v55 = vld [vmem:[#allocation9 + $0x44] ss:$16 sps:$4 sm:$0xff]   ;;  %v5475_v5 = vld [vmem:[#allocation9 + $0x1ac] ss:$16 sps:$4 sm:$0xff]  }
 0x21b   :  { %2692 = vmatprep.subr.bf16.mxu0 %v5310_v10  ;;  %2774 = vmatprep.subr.bf16.mxu1 %v5313_v12  ;;  %v5394_v10 = vld [vmem:[#allocation9 + $0x4] ss:$16 sps:$4 sm:$0xff]   ;;  %v5397_v12 = vld [vmem:[#allocation9 + $0xc] ss:$16 sps:$4 sm:$0xff]  }
 0x21e   :  { %2693 = vmatpush1.bf16.msra.mxu0 %v5308_v13  ;;  %2775 = vmatpush1.bf16.msra.mxu1 %v5311_v14  ;;  %v5392_v13 = vld [vmem:[#allocation9] ss:$16 sps:$4 sm:$0xff]   ;;  %v5395_v14 = vld [vmem:[#allocation9 + $0x8] ss:$16 sps:$4 sm:$0xff]  }
 0x21f   :  { %2694 = vmatprep.subr.bf16.mxu0 %v5316_v15  ;;  %2776 = vmatprep.subr.bf16.mxu1 %v5319_v16  ;;  %v4740_v15 = vpack.c.bf16 %v4796_v9, %v4796_v9  ;;  %v5403_v16 = vld [vmem:[#allocation9 + $0x2c] ss:$16 sps:$4 sm:$0xff]   ;;  %v5476_v9 = vld [vmem:[#allocation9 + $0x1c0] ss:$16 sps:$4 sm:$0xff]  }
 0x222   :  { %2695 = vmatpush1.bf16.msra.mxu0 %v5314_v17  ;;  %2777 = vmatpush1.bf16.msra.mxu1 %v5317_v18  ;;  %v5398_v17 = vld [vmem:[#allocation9 + $0x20] ss:$16 sps:$4 sm:$0xff]   ;;  %v5401_v18 = vld [vmem:[#allocation9 + $0x28] ss:$16 sps:$4 sm:$0xff]  }
 0x223   :  { %2696 = vmatprep.subr.bf16.mxu0 %v5322_v19  ;;  %2778 = vmatprep.subr.bf16.mxu1 %v5325_v20  ;;  %v5409_v19 = vld [vmem:[#allocation9 + $0x4c] ss:$16 sps:$4 sm:$0xff]   ;;  %v5404_v20 = vld [vmem:[#allocation9 + $0x40] ss:$16 sps:$4 sm:$0xff]  }
 0x226   :  { %2697 = vmatpush1.bf16.msra.mxu0 %v5320_v21  ;;  %2779 = vmatpush1.bf16.msra.mxu1 %v5323_v22  ;;  %v5407_v21 = vld [vmem:[#allocation9 + $0x48] ss:$16 sps:$4 sm:$0xff]   ;;  %v5412_v22 = vld [vmem:[#allocation9 + $0x64] ss:$16 sps:$4 sm:$0xff]  }
 0x227   :  { %2698 = vmatprep.subr.bf16.mxu0 %v5328_v11  ;;  %2780 = vmatprep.subr.bf16.mxu1 %v5331_v23  ;;  %v5415_v11 = vld [vmem:[#allocation9 + $0x6c] ss:$16 sps:$4 sm:$0xff]   ;;  %v5410_v23 = vld [vmem:[#allocation9 + $0x60] ss:$16 sps:$4 sm:$0xff]  }
 0x22a   :  { %2699 = vmatpush1.bf16.msra.mxu0 %v5326_v24  ;;  %2781 = vmatpush1.bf16.msra.mxu1 %v5329_v25  ;;  %v5413_v24 = vld [vmem:[#allocation9 + $0x68] ss:$16 sps:$4 sm:$0xff]   ;;  %v5418_v25 = vld [vmem:[#allocation9 + $0x84] ss:$16 sps:$4 sm:$0xff]  }
 0x22b   :  { %2700 = vmatprep.subr.bf16.mxu0 %v5334_v26  ;;  %2782 = vmatprep.subr.bf16.mxu1 %v5337_v27  ;;  %v5421_v26 = vld [vmem:[#allocation9 + $0x8c] ss:$16 sps:$4 sm:$0xff]   ;;  %v5416_v27 = vld [vmem:[#allocation9 + $0x80] ss:$16 sps:$4 sm:$0xff]  }
 0x22e   :  { %2701 = vmatpush1.bf16.msra.mxu0 %v5332_v28  ;;  %2783 = vmatpush1.bf16.msra.mxu1 %v5335_v29  ;;  %v5419_v28 = vld [vmem:[#allocation9 + $0x88] ss:$16 sps:$4 sm:$0xff]   ;;  %v5424_v29 = vld [vmem:[#allocation9 + $0xa4] ss:$16 sps:$4 sm:$0xff]  }
 0x22f   :  { %2702 = vmatprep.subr.bf16.mxu0 %v5340_v30  ;;  %2784 = vmatprep.subr.bf16.mxu1 %v5343_v31  ;;  %v5427_v30 = vld [vmem:[#allocation9 + $0xac] ss:$16 sps:$4 sm:$0xff]   ;;  %v5422_v31 = vld [vmem:[#allocation9 + $0xa0] ss:$16 sps:$4 sm:$0xff]  }
 0x232   :  { %2703 = vmatpush1.bf16.msra.mxu0 %v5338_v32  ;;  %2785 = vmatpush1.bf16.msra.mxu1 %v5341_v33  ;;  %v5425_v32 = vld [vmem:[#allocation9 + $0xa8] ss:$16 sps:$4 sm:$0xff]   ;;  %v5430_v33 = vld [vmem:[#allocation9 + $0xc4] ss:$16 sps:$4 sm:$0xff]  }
 0x233   :  { %2704 = vmatprep.subr.bf16.mxu0 %v5346_v34  ;;  %2786 = vmatprep.subr.bf16.mxu1 %v5349_v35  ;;  %v5433_v34 = vld [vmem:[#allocation9 + $0xcc] ss:$16 sps:$4 sm:$0xff]   ;;  %v5428_v35 = vld [vmem:[#allocation9 + $0xc0] ss:$16 sps:$4 sm:$0xff]  }
 0x236   :  { %2705 = vmatpush1.bf16.msra.mxu0 %v5344_v36  ;;  %2787 = vmatpush1.bf16.msra.mxu1 %v5347_v37  ;;  %v5431_v36 = vld [vmem:[#allocation9 + $0xc8] ss:$16 sps:$4 sm:$0xff]   ;;  %v5436_v37 = vld [vmem:[#allocation9 + $0xe4] ss:$16 sps:$4 sm:$0xff]  }
 0x237   :  { %2706 = vmatprep.subr.bf16.mxu0 %v5352_v38  ;;  %2788 = vmatprep.subr.bf16.mxu1 %v5355_v39  ;;  %v5439_v38 = vld [vmem:[#allocation9 + $0xec] ss:$16 sps:$4 sm:$0xff]   ;;  %v5434_v39 = vld [vmem:[#allocation9 + $0xe0] ss:$16 sps:$4 sm:$0xff]  }
 0x23a   :  { %2707 = vmatpush1.bf16.msra.mxu0 %v5350_v40  ;;  %2789 = vmatpush1.bf16.msra.mxu1 %v5353_v41  ;;  %v5437_v40 = vld [vmem:[#allocation9 + $0xe8] ss:$16 sps:$4 sm:$0xff]   ;;  %v5442_v41 = vld [vmem:[#allocation9 + $0x104] ss:$16 sps:$4 sm:$0xff]  }
 0x23b   :  { %2708 = vmatprep.subr.bf16.mxu0 %v5358_v42  ;;  %2790 = vmatprep.subr.bf16.mxu1 %v5361_v43  ;;  %v5445_v42 = vld [vmem:[#allocation9 + $0x10c] ss:$16 sps:$4 sm:$0xff]   ;;  %v5440_v43 = vld [vmem:[#allocation9 + $0x100] ss:$16 sps:$4 sm:$0xff]  }
 0x23e   :  { %2709 = vmatpush1.bf16.msra.mxu0 %v5356_v44  ;;  %2791 = vmatpush1.bf16.msra.mxu1 %v5359_v45  ;;  %v5443_v44 = vld [vmem:[#allocation9 + $0x108] ss:$16 sps:$4 sm:$0xff]   ;;  %v5448_v45 = vld [vmem:[#allocation9 + $0x124] ss:$16 sps:$4 sm:$0xff]  }
 0x23f   :  { %2710 = vmatprep.subr.bf16.mxu0 %v5364_v51  ;;  %2792 = vmatprep.subr.bf16.mxu1 %v5367_v52  ;;  %v5451_v51 = vld [vmem:[#allocation9 + $0x12c] ss:$16 sps:$4 sm:$0xff]   ;;  %v5446_v52 = vld [vmem:[#allocation9 + $0x120] ss:$16 sps:$4 sm:$0xff]  }
 0x242   :  { %2711 = vmatpush1.bf16.msra.mxu0 %v5362_v53  ;;  %2793 = vmatpush1.bf16.msra.mxu1 %v5365_v54  ;;  %v5449_v53 = vld [vmem:[#allocation9 + $0x128] ss:$16 sps:$4 sm:$0xff]   ;;  %v5454_v54 = vld [vmem:[#allocation9 + $0x144] ss:$16 sps:$4 sm:$0xff]  }
 0x243   :  { %2712 = vmatprep.subr.bf16.mxu0 %v5370_v56  ;;  %2794 = vmatprep.subr.bf16.mxu1 %v5373_v57  ;;  %v5457_v56 = vld [vmem:[#allocation9 + $0x14c] ss:$16 sps:$4 sm:$0xff]   ;;  %v5452_v57 = vld [vmem:[#allocation9 + $0x140] ss:$16 sps:$4 sm:$0xff]  }
 0x246   :  { %2713 = vmatpush1.bf16.msra.mxu0 %v5368_v58  ;;  %2795 = vmatpush1.bf16.msra.mxu1 %v5371_v59  ;;  %v5455_v58 = vld [vmem:[#allocation9 + $0x148] ss:$16 sps:$4 sm:$0xff]   ;;  %v5460_v59 = vld [vmem:[#allocation9 + $0x164] ss:$16 sps:$4 sm:$0xff]  }
 0x247   :  { %2714 = vmatprep.subr.bf16.mxu0 %v5376_v60  ;;  %2796 = vmatprep.subr.bf16.mxu1 %v5379_v61  ;;  %v5463_v60 = vld [vmem:[#allocation9 + $0x16c] ss:$16 sps:$4 sm:$0xff]   ;;  %v5458_v61 = vld [vmem:[#allocation9 + $0x160] ss:$16 sps:$4 sm:$0xff]  }
 0x24a   :  { %2715 = vmatpush1.bf16.msra.mxu0 %v5374_v62  ;;  %2797 = vmatpush1.bf16.msra.mxu1 %v5377_v63  ;;  %v5461_v62 = vld [vmem:[#allocation9 + $0x168] ss:$16 sps:$4 sm:$0xff]   ;;  %v5466_v63 = vld [vmem:[#allocation9 + $0x184] ss:$16 sps:$4 sm:$0xff]  }
 0x24b   :  { %2716 = vmatprep.subr.bf16.mxu0 %v5382_v1  ;;  %2798 = vmatprep.subr.bf16.mxu1 %v5385_v2  ;;  %v5469_v1 = vld [vmem:[#allocation9 + $0x18c] ss:$16 sps:$4 sm:$0xff]   ;;  %v5464_v2 = vld [vmem:[#allocation9 + $0x180] ss:$16 sps:$4 sm:$0xff]  }
 0x24e   :  { %2717 = vmatpush1.bf16.msra.mxu0 %v5380_v3  ;;  %2799 = vmatpush1.bf16.msra.mxu1 %v5383_v4  ;;  %v5467_v3 = vld [vmem:[#allocation9 + $0x188] ss:$16 sps:$4 sm:$0xff]   ;;  %v5472_v4 = vld [vmem:[#allocation9 + $0x1a4] ss:$16 sps:$4 sm:$0xff]  }
 0x24f   :  { %2718 = vmatprep.subr.bf16.mxu0 %v5388_v6  ;;  %2800 = vmatprep.subr.bf16.mxu1 %v5391_v7  ;;  %v5470_v6 = vld [vmem:[#allocation9 + $0x1a0] ss:$16 sps:$4 sm:$0xff]   ;;  %v5473_v7 = vld [vmem:[#allocation9 + $0x1a8] ss:$16 sps:$4 sm:$0xff]  }
 0x252   :  { %2719 = vmatpush1.bf16.msra.mxu0 %v5386_v8  ;;  %2801 = vmatpush1.bf16.msra.mxu1 %v5389_v46  ;;  %v5478_v8 = vld [vmem:[#allocation9 + $0x1c4] ss:$16 sps:$4 sm:$0xff]   ;;  %v5481_v46 = vld [vmem:[#allocation9 + $0x1cc] ss:$16 sps:$4 sm:$0xff]  }
 0x253   :  { %3635 = vmatprep.subr.bf16.mxu0 %v5394_v10  ;;  %3717 = vmatprep.subr.bf16.mxu1 %v5397_v12  ;;  %v5479_v10 = vld [vmem:[#allocation9 + $0x1c8] ss:$16 sps:$4 sm:$0xff]   ;;  %v5484_v12 = vld [vmem:[#allocation9 + $0x1e4] ss:$16 sps:$4 sm:$0xff]  }
 0x255   :  { %2721 = vmatmul.mubr.bf16.vlgmr.msra.gmra.mrb[4].mxu0 %v4740_v15  ;;  %2803 = vmatmul.mubr.bf16.vlgmr.msra.gmra.mrb[4].mxu1 %v4740_v15  ;;  %v5485_v15 = vld [vmem:[#allocation9 + $0x1e8] ss:$16 sps:$4 sm:$0xff]  }
 0x256   :  { %3636 = vmatpush1.bf16.msra.mxu0 %v5392_v13  ;;  %3718 = vmatpush1.bf16.msra.mxu1 %v5395_v14  ;;  %v5487_v13 = vld [vmem:[#allocation9 + $0x1ec] ss:$16 sps:$4 sm:$0xff]   ;;  %v5482_v14 = vld [vmem:[#allocation9 + $0x1e0] ss:$16 sps:$4 sm:$0xff]  }
 0x257   :  { %3637 = vmatprep.subr.bf16.mxu0 %v5400_v48  ;;  %3719 = vmatprep.subr.bf16.mxu1 %v5403_v16  ;;  %v5490_v48 = vld [vmem:[#allocation9 + $0x204] ss:$16 sps:$4 sm:$0xff]   ;;  %v5493_v16 = vld [vmem:[#allocation9 + $0x20c] ss:$16 sps:$4 sm:$0xff]  }
 0x25a   :  { %3638 = vmatpush1.bf16.msra.mxu0 %v5398_v17  ;;  %3720 = vmatpush1.bf16.msra.mxu1 %v5401_v18  ;;  %v5931_v17 = vld [vmem:[%s5970_s4] sm:$0xf] }
 0x25b   :  { %3639 = vmatprep.subr.bf16.mxu0 %v5406_v55  ;;  %3721 = vmatprep.subr.bf16.mxu1 %v5409_v19  ;;  %v1976_v18 = vrot.slane %v5931_v17, %v5901_v47  ;;  %v1980_v55 = vrot.slane %v5931_v17, %v5909_v49  ;;  %v1988_v19 = vrot.slane %v5931_v17, %v5912_v50 }
 0x25e   :  { %3640 = vmatpush1.bf16.msra.mxu0 %v5404_v20  ;;  %3722 = vmatpush1.bf16.msra.mxu1 %v5407_v21 }
 0x25f   :  { %3641 = vmatprep.subr.bf16.mxu0 %v5412_v22  ;;  %3723 = vmatprep.subr.bf16.mxu1 %v5415_v11 }
 0x262   :  { %3642 = vmatpush1.bf16.msra.mxu0 %v5410_v23  ;;  %3724 = vmatpush1.bf16.msra.mxu1 %v5413_v24 }
 0x263   :  { %3643 = vmatprep.subr.bf16.mxu0 %v5418_v25  ;;  %3725 = vmatprep.subr.bf16.mxu1 %v5421_v26 }
 0x266   :  { %3644 = vmatpush1.bf16.msra.mxu0 %v5416_v27  ;;  %3726 = vmatpush1.bf16.msra.mxu1 %v5419_v28 }
 0x267   :  { %3645 = vmatprep.subr.bf16.mxu0 %v5424_v29  ;;  %3727 = vmatprep.subr.bf16.mxu1 %v5427_v30 }
 0x26a   :  { %3646 = vmatpush1.bf16.msra.mxu0 %v5422_v31  ;;  %3728 = vmatpush1.bf16.msra.mxu1 %v5425_v32  ;;  %v5488_v31 = vld [vmem:[#allocation9 + $0x200] ss:$16 sps:$4 sm:$0xff]   ;;  %v5491_v32 = vld [vmem:[#allocation9 + $0x208] ss:$16 sps:$4 sm:$0xff]  }
 0x26b   :  { %3647 = vmatprep.subr.bf16.mxu0 %v5430_v33  ;;  %3729 = vmatprep.subr.bf16.mxu1 %v5433_v34  ;;  %v5496_v34 = vld [vmem:[#allocation9 + $0x224] ss:$16 sps:$4 sm:$0xff]  }
 0x26e   :  { %3648 = vmatpush1.bf16.msra.mxu0 %v5428_v35  ;;  %3730 = vmatpush1.bf16.msra.mxu1 %v5431_v36  ;;  %v5499_v35 = vld [vmem:[#allocation9 + $0x22c] ss:$16 sps:$4 sm:$0xff]  }
 0x26f   :  { %3649 = vmatprep.subr.bf16.mxu0 %v5436_v37  ;;  %3731 = vmatprep.subr.bf16.mxu1 %v5439_v38  ;;  %v5494_v37 = vld [vmem:[#allocation9 + $0x220] ss:$16 sps:$4 sm:$0xff]   ;;  %v5497_v38 = vld [vmem:[#allocation9 + $0x228] ss:$16 sps:$4 sm:$0xff]  }
 0x272   :  { %3650 = vmatpush1.bf16.msra.mxu0 %v5434_v39  ;;  %3732 = vmatpush1.bf16.msra.mxu1 %v5437_v40  ;;  %v5502_v39 = vld [vmem:[#allocation9 + $0x244] ss:$16 sps:$4 sm:$0xff]   ;;  %v5505_v40 = vld [vmem:[#allocation9 + $0x24c] ss:$16 sps:$4 sm:$0xff]  }
 0x273   :  { %3651 = vmatprep.subr.bf16.mxu0 %v5442_v41  ;;  %3733 = vmatprep.subr.bf16.mxu1 %v5445_v42  ;;  %v5500_v41 = vld [vmem:[#allocation9 + $0x240] ss:$16 sps:$4 sm:$0xff]   ;;  %v5503_v42 = vld [vmem:[#allocation9 + $0x248] ss:$16 sps:$4 sm:$0xff]  }
 0x276   :  { %3652 = vmatpush1.bf16.msra.mxu0 %v5440_v43  ;;  %3734 = vmatpush1.bf16.msra.mxu1 %v5443_v44  ;;  %v5508_v43 = vld [vmem:[#allocation9 + $0x264] ss:$16 sps:$4 sm:$0xff]   ;;  %v5511_v44 = vld [vmem:[#allocation9 + $0x26c] ss:$16 sps:$4 sm:$0xff]  }
 0x277   :  { %3653 = vmatprep.subr.bf16.mxu0 %v5448_v45  ;;  %3735 = vmatprep.subr.bf16.mxu1 %v5451_v51  ;;  %v5506_v45 = vld [vmem:[#allocation9 + $0x260] ss:$16 sps:$4 sm:$0xff]   ;;  %v5509_v51 = vld [vmem:[#allocation9 + $0x268] ss:$16 sps:$4 sm:$0xff]  }
 0x27a   :  { %3654 = vmatpush1.bf16.msra.mxu0 %v5446_v52  ;;  %3736 = vmatpush1.bf16.msra.mxu1 %v5449_v53  ;;  %v5514_v52 = vld [vmem:[#allocation9 + $0x284] ss:$16 sps:$4 sm:$0xff]   ;;  %v5517_v53 = vld [vmem:[#allocation9 + $0x28c] ss:$16 sps:$4 sm:$0xff]  }
 0x27b   :  { %3655 = vmatprep.subr.bf16.mxu0 %v5454_v54  ;;  %3737 = vmatprep.subr.bf16.mxu1 %v5457_v56  ;;  %v5512_v54 = vld [vmem:[#allocation9 + $0x280] ss:$16 sps:$4 sm:$0xff]   ;;  %v5515_v56 = vld [vmem:[#allocation9 + $0x288] ss:$16 sps:$4 sm:$0xff]  }
 0x27e   :  { %3656 = vmatpush1.bf16.msra.mxu0 %v5452_v57  ;;  %3738 = vmatpush1.bf16.msra.mxu1 %v5455_v58  ;;  %v5520_v57 = vld [vmem:[#allocation9 + $0x2a4] ss:$16 sps:$4 sm:$0xff]   ;;  %v5523_v58 = vld [vmem:[#allocation9 + $0x2ac] ss:$16 sps:$4 sm:$0xff]  }
 0x27f   :  { %3657 = vmatprep.subr.bf16.mxu0 %v5460_v59  ;;  %3739 = vmatprep.subr.bf16.mxu1 %v5463_v60  ;;  %v5518_v59 = vld [vmem:[#allocation9 + $0x2a0] ss:$16 sps:$4 sm:$0xff]   ;;  %v5521_v60 = vld [vmem:[#allocation9 + $0x2a8] ss:$16 sps:$4 sm:$0xff]  }
 0x282   :  { %3658 = vmatpush1.bf16.msra.mxu0 %v5458_v61  ;;  %3740 = vmatpush1.bf16.msra.mxu1 %v5461_v62  ;;  %v5526_v61 = vld [vmem:[#allocation9 + $0x2c4] ss:$16 sps:$4 sm:$0xff]   ;;  %v5529_v62 = vld [vmem:[#allocation9 + $0x2cc] ss:$16 sps:$4 sm:$0xff]  }
 0x283   :  { %3659 = vmatprep.subr.bf16.mxu0 %v5466_v63  ;;  %3741 = vmatprep.subr.bf16.mxu1 %v5469_v1  ;;  %v5524_v63 = vld [vmem:[#allocation9 + $0x2c0] ss:$16 sps:$4 sm:$0xff]   ;;  %v5527_v1 = vld [vmem:[#allocation9 + $0x2c8] ss:$16 sps:$4 sm:$0xff]  }
 0x286   :  { %3660 = vmatpush1.bf16.msra.mxu0 %v5464_v2  ;;  %3742 = vmatpush1.bf16.msra.mxu1 %v5467_v3  ;;  %v5532_v2 = vld [vmem:[#allocation9 + $0x2e4] ss:$16 sps:$4 sm:$0xff]   ;;  %v5535_v3 = vld [vmem:[#allocation9 + $0x2ec] ss:$16 sps:$4 sm:$0xff]  }
 0x287   :  { %3661 = vmatprep.subr.bf16.mxu0 %v5472_v4  ;;  %3743 = vmatprep.subr.bf16.mxu1 %v5475_v5  ;;  %v5530_v4 = vld [vmem:[#allocation9 + $0x2e0] ss:$16 sps:$4 sm:$0xff]   ;;  %v5533_v5 = vld [vmem:[#allocation9 + $0x2e8] ss:$16 sps:$4 sm:$0xff]  }
 0x28a   :  { %3662 = vmatpush1.bf16.msra.mxu0 %v5470_v6  ;;  %3744 = vmatpush1.bf16.msra.mxu1 %v5473_v7  ;;  %v5538_v6 = vld [vmem:[#allocation9 + $0x304] ss:$16 sps:$4 sm:$0xff]   ;;  %v5541_v7 = vld [vmem:[#allocation9 + $0x30c] ss:$16 sps:$4 sm:$0xff]  }
 0x28b   :  { %3663 = vmatprep.subr.bf16.mxu0 %v5478_v8  ;;  %3745 = vmatprep.subr.bf16.mxu1 %v5481_v46  ;;  %v5536_v8 = vld [vmem:[#allocation9 + $0x300] ss:$16 sps:$4 sm:$0xff]   ;;  %v5539_v46 = vld [vmem:[#allocation9 + $0x308] ss:$16 sps:$4 sm:$0xff]  }
 0x28e   :  { %3664 = vmatpush1.bf16.msra.mxu0 %v5476_v9  ;;  %3746 = vmatpush1.bf16.msra.mxu1 %v5479_v10  ;;  %v5544_v9 = vld [vmem:[#allocation9 + $0x324] ss:$16 sps:$4 sm:$0xff]   ;;  %v5547_v10 = vld [vmem:[#allocation9 + $0x32c] ss:$16 sps:$4 sm:$0xff]  }
 0x28f   :  { %3665 = vmatprep.subr.bf16.mxu0 %v5484_v12  ;;  %3747 = vmatprep.subr.bf16.mxu1 %v5487_v13  ;;  %v5542_v12 = vld [vmem:[#allocation9 + $0x320] ss:$16 sps:$4 sm:$0xff]   ;;  %v5545_v13 = vld [vmem:[#allocation9 + $0x328] ss:$16 sps:$4 sm:$0xff]  }
 0x292   :  { %3666 = vmatpush1.bf16.msra.mxu0 %v5482_v14  ;;  %3748 = vmatpush1.bf16.msra.mxu1 %v5485_v15  ;;  %v5550_v14 = vld [vmem:[#allocation9 + $0x344] ss:$16 sps:$4 sm:$0xff]   ;;  %v5553_v15 = vld [vmem:[#allocation9 + $0x34c] ss:$16 sps:$4 sm:$0xff]  }
 0x293   :  { %3676 = vmatprep.subr.bf16.mxu0 %v5490_v48  ;;  %3758 = vmatprep.subr.bf16.mxu1 %v5493_v16  ;;  %v5548_v48 = vld [vmem:[#allocation9 + $0x340] ss:$16 sps:$4 sm:$0xff]   ;;  %v5551_v16 = vld [vmem:[#allocation9 + $0x348] ss:$16 sps:$4 sm:$0xff]  }
 0x328   :  { %v2722_v20 = vpop.f32.mrb[4].mxu0  ;;  %v5939_v21 = vpop.f32.mrb[4].mxu1 }
 0x329   :  { %v4798_v22 = vadd.f32 %v2722_v20, %v1976_v18  ;;  %v2724_v11 = vpop.f32.mrb[5].mxu0  ;;  %v2806_v23 = vpop.f32.mrb[5].mxu1  ;;  %v5556_v18 = vld [vmem:[#allocation9 + $0x364] ss:$16 sps:$4 sm:$0xff]   ;;  %v5557_v20 = vld [vmem:[#allocation9 + $0x368] ss:$16 sps:$4 sm:$0xff]  }
 0x32a   :  { %v4799_v24 = vadd.f32 %v2724_v11, %v1980_v55  ;;  %v2726_v25 = vpop.f32.mrb[6].mxu0  ;;  %v2808_v26 = vpop.f32.mrb[6].mxu1  ;;  %v4801_v27 = vadd.f32 %v2806_v23, %v1988_v19  ;;  %v5559_v55 = vld [vmem:[#allocation9 + $0x36c] ss:$16 sps:$4 sm:$0xff]   ;;  %v5554_v19 = vld [vmem:[#allocation9 + $0x360] ss:$16 sps:$4 sm:$0xff]  }
 0x32b   :  { %v2727_v28 = vpop.f32.mrb[7].mxu0  ;;  %v2809_v29 = vpop.f32.mrb[7].mxu1  ;;  %v4742_v33 = vpack.c.bf16 %v4798_v22, %v4798_v22  ;;  %v5562_v22 = vld [vmem:[#allocation9 + $0x384] ss:$16 sps:$4 sm:$0xff]   ;;  %v5565_v11 = vld [vmem:[#allocation9 + $0x38c] ss:$16 sps:$4 sm:$0xff]  }
 0x32c   :  { %v4743_v30 = vpack.c.bf16 %v4799_v24, %v4799_v24  ;;  %v4745_v36 = vpack.c.bf16 %v4801_v27, %v4801_v27  ;;  %v5560_v23 = vld [vmem:[#allocation9 + $0x380] ss:$16 sps:$4 sm:$0xff]   ;;  %v5563_v24 = vld [vmem:[#allocation9 + $0x388] ss:$16 sps:$4 sm:$0xff]   ;;  %v5568_v25 = vld [vmem:[#allocation9 + $0x3a4] ss:$16 sps:$4 sm:$0xff]  }
 0x32d   :  { %v5571_v26 = vld [vmem:[#allocation9 + $0x3ac] ss:$16 sps:$4 sm:$0xff]   ;;  %v5566_v27 = vld [vmem:[#allocation9 + $0x3a0] ss:$16 sps:$4 sm:$0xff]   ;;  %v5569_v28 = vld [vmem:[#allocation9 + $0x3a8] ss:$16 sps:$4 sm:$0xff]  }
 0x32e   :  { %3667 = vmatprep.mubr.bf16.mxu0 %v4743_v30  ;;  %3749 = vmatprep.mubr.bf16.mxu1 %v4743_v30  ;;  %v5574_v29 = vld [vmem:[#allocation9 + $0x3c4] ss:$16 sps:$4 sm:$0xff]   ;;  %v5577_v30 = vld [vmem:[#allocation9 + $0x3cc] ss:$16 sps:$4 sm:$0xff]  }
 0x32f   :  { %3668 = vmatmul.mubr.bf16.vlgmr.msra.gmra.mrb[8].mxu0 %v4742_v33  ;;  %3750 = vmatmul.mubr.bf16.vlgmr.msra.gmra.mrb[8].mxu1 %v4742_v33  ;;  %v1984_v33 = vrot.slane %v5931_v17, %v5923_v0  ;;  %v5588_v17 = vld [vmem:[#allocation11 + $0x48] sm:$0xff]  }
 0x330   :  { %3677 = vmatpush1.bf16.msra.mxu0 %v5488_v31  ;;  %3759 = vmatpush1.bf16.msra.mxu1 %v5491_v32  ;;  %v5572_v31 = vld [vmem:[#allocation9 + $0x3c0] ss:$16 sps:$4 sm:$0xff]   ;;  %v5575_v32 = vld [vmem:[#allocation9 + $0x3c8] ss:$16 sps:$4 sm:$0xff]  }
 0x331   :  { %3708 = vmatprep.mubr.bf16.mxu0 %v4745_v36  ;;  %3790 = vmatprep.mubr.bf16.mxu1 %v4745_v36  ;;  %v5578_v36 = vld [vmem:[#allocation9 + $0x3e0] ss:$16 sps:$4 sm:$0xff]  }
 0x332   :  { %3678 = vmatprep.subr.bf16.mxu0 %v5496_v34  ;;  %3760 = vmatprep.subr.bf16.mxu1 %v5499_v35  ;;  %v5580_v34 = vld [vmem:[#allocation9 + $0x3e4] ss:$16 sps:$4 sm:$0xff]   ;;  %v5583_v35 = vld [vmem:[#allocation9 + $0x3ec] ss:$16 sps:$4 sm:$0xff]  }
 0x334   :  { %3679 = vmatpush1.bf16.msra.mxu0 %v5494_v37  ;;  %3761 = vmatpush1.bf16.msra.mxu1 %v5497_v38  ;;  %v5581_v37 = vld [vmem:[#allocation9 + $0x3e8] ss:$16 sps:$4 sm:$0xff]   ;;  %v4800_v38 = vadd.f32 %v5939_v21, %v1984_v33  ;;  %v5592_v21 = vld [vmem:[#allocation11 + $0x50] sm:$0xff]  }
 0x335   :  { %3680 = vmatprep.subr.bf16.mxu0 %v5502_v39  ;;  %3762 = vmatprep.subr.bf16.mxu1 %v5505_v40  ;;  %v5584_v39 = vld [vmem:[#allocation11 + $0x40] sm:$0xff]  }
 0x336   :  { %v5585_v40 = vld [vmem:[#allocation11 + $0xc0] sm:$0xff]  }
 0x338   :  { %3681 = vmatpush1.bf16.msra.mxu0 %v5500_v41  ;;  %3763 = vmatpush1.bf16.msra.mxu1 %v5503_v42  ;;  %v5586_v41 = vld [vmem:[#allocation11] sm:$0xff]  }
 0x339   :  { %3682 = vmatprep.subr.bf16.mxu0 %v5508_v43  ;;  %3764 = vmatprep.subr.bf16.mxu1 %v5511_v44  ;;  %v5587_v42 = vld [vmem:[#allocation11 + $0x80] sm:$0xff]   ;;  %v4744_v43 = vpack.c.bf16 %v4800_v38, %v4800_v38  ;;  %v5589_v44 = vld [vmem:[#allocation11 + $0xc8] sm:$0xff]  }
 0x33c   :  { %3683 = vmatpush1.bf16.msra.mxu0 %v5506_v45  ;;  %3765 = vmatpush1.bf16.msra.mxu1 %v5509_v51  ;;  %v5590_v45 = vld [vmem:[#allocation11 + $0x8] sm:$0xff]  }
 0x33d   :  { %3684 = vmatprep.subr.bf16.mxu0 %v5514_v52  ;;  %3766 = vmatprep.subr.bf16.mxu1 %v5517_v53  ;;  %v5591_v51 = vld [vmem:[#allocation11 + $0x88] sm:$0xff]   ;;  %v5593_v52 = vld [vmem:[#allocation11 + $0xd0] sm:$0xff]  }
 0x33e   :  { %v5594_v53 = vld [vmem:[#allocation11 + $0x10] sm:$0xff]  }
 0x340   :  { %3685 = vmatpush1.bf16.msra.mxu0 %v5512_v54  ;;  %3767 = vmatpush1.bf16.msra.mxu1 %v5515_v56  ;;  %v5595_v54 = vld [vmem:[#allocation11 + $0x90] sm:$0xff]   ;;  %v5596_v56 = vld [vmem:[#allocation11 + $0x58] sm:$0xff]  }
 0x341   :  { %3686 = vmatprep.subr.bf16.mxu0 %v5520_v57  ;;  %3768 = vmatprep.subr.bf16.mxu1 %v5523_v58  ;;  %v5597_v57 = vld [vmem:[#allocation11 + $0xd8] sm:$0xff]  }
 0x342   :  { %v5598_v58 = vld [vmem:[#allocation11 + $0x18] sm:$0xff]  }
 0x344   :  { %3687 = vmatpush1.bf16.msra.mxu0 %v5518_v59  ;;  %3769 = vmatpush1.bf16.msra.mxu1 %v5521_v60  ;;  %v5599_v59 = vld [vmem:[#allocation11 + $0x98] sm:$0xff]   ;;  %v5600_v60 = vld [vmem:[#allocation11 + $0x60] sm:$0xff]  }
 0x345   :  { %3688 = vmatprep.subr.bf16.mxu0 %v5526_v61  ;;  %3770 = vmatprep.subr.bf16.mxu1 %v5529_v62  ;;  %v5601_v61 = vld [vmem:[#allocation11 + $0xe0] sm:$0xff]  }
 0x346   :  { %v5602_v62 = vld [vmem:[#allocation11 + $0x20] sm:$0xff]  }
 0x348   :  { %3689 = vmatpush1.bf16.msra.mxu0 %v5524_v63  ;;  %3771 = vmatpush1.bf16.msra.mxu1 %v5527_v1  ;;  %v5603_v63 = vld [vmem:[#allocation11 + $0xa0] sm:$0xff]   ;;  %v5604_v1 = vld [vmem:[#allocation11 + $0x68] sm:$0xff]  }
 0x349   :  { %3690 = vmatprep.subr.bf16.mxu0 %v5532_v2  ;;  %3772 = vmatprep.subr.bf16.mxu1 %v5535_v3  ;;  %v5605_v2 = vld [vmem:[#allocation11 + $0xe8] sm:$0xff]  }
 0x34a   :  { %v5606_v3 = vld [vmem:[#allocation11 + $0x28] sm:$0xff]  }
 0x34c   :  { %3691 = vmatpush1.bf16.msra.mxu0 %v5530_v4  ;;  %3773 = vmatpush1.bf16.msra.mxu1 %v5533_v5  ;;  %v5607_v4 = vld [vmem:[#allocation11 + $0xa8] sm:$0xff]   ;;  %v5608_v5 = vld [vmem:[#allocation11 + $0x70] sm:$0xff]  }
 0x34d   :  { %3692 = vmatprep.subr.bf16.mxu0 %v5538_v6  ;;  %3774 = vmatprep.subr.bf16.mxu1 %v5541_v7  ;;  %v5609_v6 = vld [vmem:[#allocation11 + $0xf0] sm:$0xff]  }
 0x34e   :  { %v5610_v7 = vld [vmem:[#allocation11 + $0x30] sm:$0xff]  }
 0x350   :  { %3693 = vmatpush1.bf16.msra.mxu0 %v5536_v8  ;;  %3775 = vmatpush1.bf16.msra.mxu1 %v5539_v46  ;;  %v5611_v8 = vld [vmem:[#allocation11 + $0xb0] sm:$0xff]   ;;  %v5612_v46 = vld [vmem:[#allocation11 + $0x78] sm:$0xff]  }
 0x351   :  { %3694 = vmatprep.subr.bf16.mxu0 %v5544_v9  ;;  %3776 = vmatprep.subr.bf16.mxu1 %v5547_v10  ;;  %v5613_v9 = vld [vmem:[#allocation11 + $0xf8] sm:$0xff]  }
 0x352   :  { %v5614_v10 = vld [vmem:[#allocation11 + $0x38] sm:$0xff]  }
 0x354   :  { %3695 = vmatpush1.bf16.msra.mxu0 %v5542_v12  ;;  %3777 = vmatpush1.bf16.msra.mxu1 %v5545_v13  ;;  %v5615_v12 = vld [vmem:[#allocation11 + $0xb8] sm:$0xff]   ;;  %v2959_v13 = vld [vmem:[%s5972_s6] sm:$0xf] }
 0x355   :  { %3696 = vmatprep.subr.bf16.mxu0 %v5550_v14  ;;  %3778 = vmatprep.subr.bf16.mxu1 %v5553_v15  ;;  %v2964_v14 = vrot.slane %v2959_v13, %v5901_v47  ;;  %v2972_v15 = vrot.slane %v2959_v13, %v5923_v0 }
 0x358   :  { %3697 = vmatpush1.bf16.msra.mxu0 %v5548_v48  ;;  %3779 = vmatpush1.bf16.msra.mxu1 %v5551_v16  ;;  %v2968_v48 = vrot.slane %v2959_v13, %v5909_v49  ;;  %v2976_v16 = vrot.slane %v2959_v13, %v5912_v50 }
 0x359   :  { %3698 = vmatprep.subr.bf16.mxu0 %v5556_v18  ;;  %3780 = vmatprep.subr.bf16.mxu1 %v5559_v55 }
 0x35c   :  { %3699 = vmatpush1.bf16.msra.mxu0 %v5554_v19  ;;  %3781 = vmatpush1.bf16.msra.mxu1 %v5557_v20 }
 0x35d   :  { %3700 = vmatprep.subr.bf16.mxu0 %v5562_v22  ;;  %3782 = vmatprep.subr.bf16.mxu1 %v5565_v11 }
 0x360   :  { %3701 = vmatpush1.bf16.msra.mxu0 %v5560_v23  ;;  %3783 = vmatpush1.bf16.msra.mxu1 %v5563_v24 }
 0x361   :  { %3702 = vmatprep.subr.bf16.mxu0 %v5568_v25  ;;  %3784 = vmatprep.subr.bf16.mxu1 %v5571_v26 }
 0x364   :  { %3703 = vmatpush1.bf16.msra.mxu0 %v5566_v27  ;;  %3785 = vmatpush1.bf16.msra.mxu1 %v5569_v28 }
 0x365   :  { %3704 = vmatprep.subr.bf16.mxu0 %v5574_v29  ;;  %3786 = vmatprep.subr.bf16.mxu1 %v5577_v30 }
 0x368   :  { %3705 = vmatpush1.bf16.msra.mxu0 %v5572_v31  ;;  %3787 = vmatpush1.bf16.msra.mxu1 %v5575_v32  ;;  %v4695_v31 = vld [vmem:[%s5974_s8] ss:$0 sm:$0xff] }
 0x369   :  { %3706 = vmatprep.subr.bf16.mxu0 %v5580_v34  ;;  %3788 = vmatprep.subr.bf16.mxu1 %v5583_v35 }
 0x36c   :  { %3707 = vmatpush1.bf16.msra.mxu0 %v5578_v36  ;;  %3789 = vmatpush1.bf16.msra.mxu1 %v5581_v37 }
 0x36d   :  { %4750 = vmatprep.subr.bf16.mxu0 %v5584_v39  ;;  %4772 = vmatprep.subr.bf16.mxu1 %v5585_v40 }
 0x36f   :  { %3709 = vmatmul.mubr.bf16.vlgmr.msra.gmra.mrb[8].mxu0 %v4744_v43  ;;  %3791 = vmatmul.mubr.bf16.vlgmr.msra.gmra.mrb[8].mxu1 %v4744_v43 }
 0x370   :  { %4751 = vmatpush3.bf16.msra.mxu0 %v5586_v41  ;;  %4773 = vmatpush3.bf16.msra.mxu1 %v5587_v42 }
 0x371   :  { %4752 = vmatprep.subr.bf16.mxu0 %v5588_v17  ;;  %4774 = vmatprep.subr.bf16.mxu1 %v5589_v44 }
 0x374   :  { %4753 = vmatpush3.bf16.msra.mxu0 %v5590_v45  ;;  %4775 = vmatpush3.bf16.msra.mxu1 %v5591_v51 }
 0x375   :  { %4754 = vmatprep.subr.bf16.mxu0 %v5592_v21  ;;  %4776 = vmatprep.subr.bf16.mxu1 %v5593_v52 }
 0x378   :  { %4755 = vmatpush3.bf16.msra.mxu0 %v5594_v53  ;;  %4777 = vmatpush3.bf16.msra.mxu1 %v5595_v54 }
 0x379   :  { %4756 = vmatprep.subr.bf16.mxu0 %v5596_v56  ;;  %4778 = vmatprep.subr.bf16.mxu1 %v5597_v57 }
 0x37c   :  { %4757 = vmatpush3.bf16.msra.mxu0 %v5598_v58  ;;  %4779 = vmatpush3.bf16.msra.mxu1 %v5599_v59 }
 0x37d   :  { %4758 = vmatprep.subr.bf16.mxu0 %v5600_v60  ;;  %4780 = vmatprep.subr.bf16.mxu1 %v5601_v61 }
 0x380   :  { %4759 = vmatpush3.bf16.msra.mxu0 %v5602_v62  ;;  %4781 = vmatpush3.bf16.msra.mxu1 %v5603_v63 }
 0x381   :  { %4760 = vmatprep.subr.bf16.mxu0 %v5604_v1  ;;  %4782 = vmatprep.subr.bf16.mxu1 %v5605_v2 }
 0x384   :  { %4761 = vmatpush3.bf16.msra.mxu0 %v5606_v3  ;;  %4783 = vmatpush3.bf16.msra.mxu1 %v5607_v4 }
 0x385   :  { %4762 = vmatprep.subr.bf16.mxu0 %v5608_v5  ;;  %4784 = vmatprep.subr.bf16.mxu1 %v5609_v6 }
 0x388   :  { %4763 = vmatpush3.bf16.msra.mxu0 %v5610_v7  ;;  %4785 = vmatpush3.bf16.msra.mxu1 %v5611_v8 }
 0x389   :  { %4764 = vmatprep.subr.bf16.mxu0 %v5612_v46  ;;  %4786 = vmatprep.subr.bf16.mxu1 %v5613_v9 }
 0x38c   :  { %4765 = vmatpush3.bf16.msra.mxu0 %v5614_v10  ;;  %4787 = vmatpush3.bf16.msra.mxu1 %v5615_v12 }
 0x442   :  { %v3710_v18 = vpop.f32.mrb[8].mxu0  ;;  %v3792_v55 = vpop.f32.mrb[8].mxu1 }
 0x443   :  { %v4802_v19 = vadd.f32 %v3710_v18, %v2964_v14  ;;  %v4804_v20 = vadd.f32 %v3792_v55, %v2972_v15  ;;  %v3712_v22 = vpop.f32.mrb[9].mxu0  ;;  %v3794_v11 = vpop.f32.mrb[9].mxu1 }
 0x444   :  { %v4803_v23 = vadd.f32 %v3712_v22, %v2968_v48  ;;  %v4805_v24 = vadd.f32 %v3794_v11, %v2976_v16  ;;  %v3714_v25 = vpop.f32.mrb[10].mxu0  ;;  %v3796_v26 = vpop.f32.mrb[10].mxu1 }
 0x445   :  { %v3715_v27 = vpop.f32.mrb[11].mxu0  ;;  %v3797_v28 = vpop.f32.mrb[11].mxu1  ;;  %v4746_v30 = vpack.c.bf16 %v4802_v19, %v4802_v19  ;;  %v4748_v0 = vpack.c.bf16 %v4804_v20, %v4804_v20 }
 0x446   :  { %v4747_v29 = vpack.c.bf16 %v4803_v23, %v4803_v23  ;;  %v4749_v47 = vpack.c.bf16 %v4805_v24, %v4805_v24 }
 0x448   :  { %4128 = vmatprep.mubr.bf16.mxu0 %v4747_v29  ;;  %4168 = vmatprep.mubr.bf16.mxu1 %v4749_v47 }
 0x449   :  { %4129 = vmatmul.mubr.bf16.vlgmr.msra.gmra.mrb[12].mxu0 %v4746_v30  ;;  %4169 = vmatmul.mubr.bf16.vlgmr.msra.gmra.mrb[12].mxu1 %v4748_v0 }
 0x51c   :  { %v4766_v49 = vpop.f32.mrb[12].mxu0  ;;  %v4788_v50 = vpop.f32.mrb[12].mxu1 }
 0x51d   :  { %v4767_v32 = vpop.f32.mrb[13].mxu0  ;;  %v4789_v33 = vpop.f32.mrb[13].mxu1 }
 0x51e   :  { %v4768_v34 = vadd.f32 %v4767_v32, %v4766_v49  ;;  %v4790_v35 = vadd.f32 %v4789_v33, %v4788_v50  ;;  %v4769_v36 = vpop.f32.mrb[14].mxu0  ;;  %v4791_v37 = vpop.f32.mrb[14].mxu1 }
 0x51f   :  { %v4770_v38 = vpop.f32.mrb[15].mxu0  ;;  %v4792_v39 = vpop.f32.mrb[15].mxu1 }
 0x520   :  { %v4131_v40 = vadd.f32 %v4768_v34, %v4695_v31 }
 0x522   :  { %v4171_v41 = vadd.f32 %v4790_v35, %v4131_v40 }
 0x524   :  { %4176 = vst [vmem:[#allocation12] sm:$0xff] %v4171_v41 }
 0x525   :  { %5737 = shalt.err (!%p5734_p2)
}
 0x526   :  { %s5738_s14 = scalar_lea.hbm %s5975_s9, 128 }
 0x527   :  { %p5739_p3 = scmp.ne.s32.totalorder %s5975_s9, %s5738_s14  ;;  %p5742_p4 = scmp.lt.u32.totalorder %s5738_s14, %s5975_s9 }
 0x529   :  { %p5744_p5 = pnand %p5742_p4, %p5739_p3 }
 0x52b   :  { %5747 = shalt.err (!%p5744_p5)
}
 0x52c   :  { %4186 = dma.vmem_to_hbm [thread:$0]  %s4184_s13, 128, %s5975_s9, [#allocation5]  }
 0x52d   :  { %5754 = dma.done.wait [#allocation5], 128  }
 0x52e   :  { %5755 = vsyncadd [#allocation5], 4294967168 }
 0x52f   :  { %4190 = vsyncpa [#allocation4], 1 }
 0x530   :  { %4191 = vsyncpa [#allocation7], 1 }
 0x531   :  { %4192 = vsyncpa [#allocation10], 1 }
 0x532   :  { %4193 = vsyncpa [#allocation5], 1 }

</bundles_post_ra>
